<compile_context>
chip_gen: v5e
topology: v5e:2x2
jax: 0.10.0
libtpu: 0.0.40
codegen_flags: <defaults>
</compile_context>

<pallas_src>
import math

import jax
import jax.numpy as jnp
from jax.experimental import pallas as pl
from jax.experimental.pallas import tpu as pltpu

HIDDEN = 256


def _actor_critic_kernel(x_ref, a_ref,
                         w1_ref, b1_ref,
                         w2a_ref, b2a_ref,
                         w2c_ref, b2c_ref,
                         w3a_ref, b3a_ref,
                         wc3_ref, inv_var_ref, scalars_ref,
                         out_ref):
    """One batch tile; batch occupies the lane dimension (lane-dense throughout)."""
    cdt = w1_ref.dtype                          # matmul compute dtype (bf16)
    x = x_ref[...].astype(cdt)                  # [S, TB]

    # Fused first layer: rows 0:H actor, H:2H critic -> one MXU pass over x.
    h1 = jnp.tanh(
        jnp.dot(w1_ref[...], x, preferred_element_type=jnp.float32) + b1_ref[...])
    h1 = h1.astype(cdt)                         # [2H, TB]
    ha, hc = h1[:HIDDEN, :], h1[HIDDEN:, :]

    h2a = jnp.tanh(
        jnp.dot(w2a_ref[...], ha, preferred_element_type=jnp.float32) + b2a_ref[...])
    h2c = jnp.tanh(
        jnp.dot(w2c_ref[...], hc, preferred_element_type=jnp.float32) + b2c_ref[...])

    # Actor head -> action mean.  [A, 256] @ [256, TB]; A rides the sublane dim.
    mu = jnp.tanh(
        jnp.dot(w3a_ref[...], h2a.astype(cdt), preferred_element_type=jnp.float32)
        + b3a_ref[...])                         # [A, TB] f32

    # Critic head (N=1): VPU multiply + sublane reduction instead of an MXU pass.
    value = jnp.sum(wc3_ref[...] * h2c, axis=0, keepdims=True) + scalars_ref[0, 1]

    # Diagonal-covariance MVN log_prob; log-det and k*log(2*pi) pre-folded into const.
    diff = a_ref[...] - mu                      # [A, TB] f32
    maha = jnp.sum(diff * diff * inv_var_ref[...], axis=0, keepdims=True)  # [1, TB]
    logprob = scalars_ref[0, 0] - 0.5 * maha

    out_ref[0:1, :] = logprob                   # lane-dense packed output
    out_ref[1:2, :] = value


def pack_params(params, action_var, compute_dtype=jnp.bfloat16):
    """Pre-transpose / fuse / cast weights for the batch-in-lanes kernel layout.

    Weights become [out, in]; biases become [out, 1] columns. The actor/critic first
    layers (shared input) are fused into one [2H, S] matmul. Matmul weights are bf16;
    biases, critic head and all per-element statistics stay f32.
    """
    A = params["wa3"].shape[1]
    w1t = jnp.concatenate([params["wa1"], params["wc1"]], axis=1).T   # [2H, S]
    b1t = jnp.concatenate([params["ba1"], params["bc1"]], axis=1).T   # [2H, 1]
    logdet = jnp.sum(jnp.log(action_var))
    const = -0.5 * (logdet + A * math.log(2.0 * math.pi))
    entropy = 0.5 * A * (1.0 + math.log(2.0 * math.pi)) + 0.5 * logdet
    return dict(
        w1t=w1t.astype(compute_dtype), b1t=b1t.astype(jnp.float32),
        w2at=params["wa2"].T.astype(compute_dtype), b2at=params["ba2"].T.astype(jnp.float32),
        w2ct=params["wc2"].T.astype(compute_dtype), b2ct=params["bc2"].T.astype(jnp.float32),
        w3at=params["wa3"].T.astype(compute_dtype), b3at=params["ba3"].T.astype(jnp.float32),
        wc3=params["wc3"].astype(jnp.float32),                        # [H, 1]
        inv_var_t=(1.0 / action_var).T.astype(jnp.float32),           # [A, 1]
        scalars=jnp.stack([const, params["bc3"][0, 0]]).reshape(1, 2).astype(jnp.float32),
        entropy=entropy.astype(jnp.float32),
    )


def actor_critic_evaluate(state, action, packed, *, block_b=512):
    """Pallas implementation of ActorCritic.evaluate(state, action).

    state:  [B, S] f32, action: [B, A] f32, packed: output of pack_params().
    Returns (action_logprobs [B], state_value [B], dist_entropy [B]).
    """
    B, S = state.shape
    A = action.shape[-1]
    H2 = 2 * HIDDEN

    block_b = max(128, (block_b // 128) * 128)            # lane tile: multiple of 128
    tb = min(block_b, ((B + 127) // 128) * 128)
    b_pad = pl.cdiv(B, tb) * tb
    grid = (b_pad // tb,)

    # Batch -> lane dimension; ragged tail handled by explicit zero padding.
    x_t = jnp.zeros((S, b_pad), jnp.float32).at[:, :B].set(state.T)
    a_t = jnp.zeros((A, b_pad), jnp.float32).at[:, :B].set(action.T)

    def resident(shape):   # whole array, constant index_map -> VMEM-resident
        return pl.BlockSpec(shape, lambda i: (0, 0))

    out = pl.pallas_call(
        _actor_critic_kernel,
        out_shape=jax.ShapeDtypeStruct((2, b_pad), jnp.float32),
        grid=grid,
        in_specs=[
            pl.BlockSpec((S, tb), lambda i: (0, i)),        # state tile
            pl.BlockSpec((A, tb), lambda i: (0, i)),        # action tile
            resident((H2, S)), resident((H2, 1)),           # fused layer 1
            resident((HIDDEN, HIDDEN)), resident((HIDDEN, 1)),   # actor layer 2
            resident((HIDDEN, HIDDEN)), resident((HIDDEN, 1)),   # critic layer 2
            resident((A, HIDDEN)), resident((A, 1)),        # actor head
            resident((HIDDEN, 1)),                          # critic head weight
            resident((A, 1)),                               # 1 / action_var
            pl.BlockSpec((1, 2), lambda i: (0, 0),
                         memory_space=pltpu.MemorySpace.SMEM),  # [logprob const, critic bias]
        ],
        out_specs=pl.BlockSpec((2, tb), lambda i: (0, i)),
        compiler_params=pltpu.CompilerParams(
            dimension_semantics=("parallel",)),
    )(x_t, a_t,
      packed["w1t"], packed["b1t"],
      packed["w2at"], packed["b2at"],
      packed["w2ct"], packed["b2ct"],
      packed["w3at"], packed["b3at"],
      packed["wc3"], packed["inv_var_t"], packed["scalars"])

    logprob = out[0, :B]
    value = out[1, :B]
    entropy = jnp.broadcast_to(packed["entropy"], (B,))     # batch-independent constant
    return logprob, value, entropy


def init_params(key, state_dim, action_dim):
    """PyTorch-style uniform init; weights stored [in, out], biases [1, out]."""
    def linear(k, fan_in, fan_out):
        kw, kb = jax.random.split(k)
        bound = 1.0 / math.sqrt(fan_in)
        w = jax.random.uniform(kw, (fan_in, fan_out), jnp.float32, -bound, bound)
        b = jax.random.uniform(kb, (1, fan_out), jnp.float32, -bound, bound)
        return w, b

    keys = jax.random.split(key, 6)
    wa1, ba1 = linear(keys[0], state_dim, HIDDEN)
    wa2, ba2 = linear(keys[1], HIDDEN, HIDDEN)
    wa3, ba3 = linear(keys[2], HIDDEN, action_dim)
    wc1, bc1 = linear(keys[3], state_dim, HIDDEN)
    wc2, bc2 = linear(keys[4], HIDDEN, HIDDEN)
    wc3, bc3 = linear(keys[5], HIDDEN, 1)
    return dict(wa1=wa1, ba1=ba1, wa2=wa2, ba2=ba2, wa3=wa3, ba3=ba3,
                wc1=wc1, bc1=bc1, wc2=wc2, bc2=bc2, wc3=wc3, bc3=bc3)


def reference_evaluate(state, action, params, action_var, compute_dtype=jnp.bfloat16):
    """Pure-JAX reference mirroring the kernel's numerics (bf16 matmuls, f32 accumulate)."""
    def mm(x, w):
        return jnp.dot(x.astype(compute_dtype), w.astype(compute_dtype),
                       preferred_element_type=jnp.float32)

    h = jnp.tanh(mm(state, params["wa1"]) + params["ba1"])
    h = jnp.tanh(mm(h, params["wa2"]) + params["ba2"])
    mu = jnp.tanh(mm(h, params["wa3"]) + params["ba3"])
    hc = jnp.tanh(mm(state, params["wc1"]) + params["bc1"])
    hc = jnp.tanh(mm(hc, params["wc2"]) + params["bc2"])
    v = (hc @ params["wc3"] + params["bc3"])[:, 0]          # critic head kept in f32

    var = action_var[0]
    k = action.shape[-1]
    diff = action - mu
    logprob = -0.5 * (jnp.sum(diff * diff / var, axis=-1)
                      + jnp.sum(jnp.log(var)) + k * math.log(2.0 * math.pi))
    entropy = 0.5 * k * (1.0 + math.log(2.0 * math.pi)) + 0.5 * jnp.sum(jnp.log(var))
    return logprob, v, jnp.broadcast_to(entropy, (action.shape[0],))


if __name__ == "__main__":
    state_dim, action_dim, action_std = 32, 8, 0.5
    batch = 12   # deliberately not a multiple of the batch tile -> exercises padding path

    key = jax.random.PRNGKey(0)
    kp, ks, ka = jax.random.split(key, 3)

    params = init_params(kp, state_dim, action_dim)
    action_var = jnp.full((1, action_dim), action_std * action_std, jnp.float32)
    packed = pack_params(params, action_var)

    state = jax.random.normal(ks, (batch, state_dim), jnp.float32)
    action = jax.random.normal(ka, (batch, action_dim), jnp.float32)

    logprob, value, entropy = actor_critic_evaluate(state, action, packed)
    jax.block_until_ready((logprob, value, entropy))

    ref_lp, ref_v, ref_e = reference_evaluate(state, action, params, action_var)
    assert jnp.allclose(logprob, ref_lp, atol=2e-3, rtol=2e-3)
    assert jnp.allclose(value, ref_v, atol=2e-3, rtol=2e-3)
    assert jnp.allclose(entropy, ref_e, atol=1e-5, rtol=1e-5)

    print("KERNEL_OK")
</pallas_src>

<mosaic_0001>
module attributes {stable_mosaic.version = 11 : i64} {
  func.func @_actor_critic_kernel(%arg0: i32, %arg1: memref<32x128xf32, #tpu.memory_space<vmem>>, %arg2: memref<8x128xf32, #tpu.memory_space<vmem>>, %arg3: memref<512x32xbf16, #tpu.memory_space<vmem>>, %arg4: memref<512x1xf32, #tpu.memory_space<vmem>>, %arg5: memref<256x256xbf16, #tpu.memory_space<vmem>>, %arg6: memref<256x1xf32, #tpu.memory_space<vmem>>, %arg7: memref<256x256xbf16, #tpu.memory_space<vmem>>, %arg8: memref<256x1xf32, #tpu.memory_space<vmem>>, %arg9: memref<8x256xbf16, #tpu.memory_space<vmem>>, %arg10: memref<8x1xf32, #tpu.memory_space<vmem>>, %arg11: memref<256x1xf32, #tpu.memory_space<vmem>>, %arg12: memref<8x1xf32, #tpu.memory_space<vmem>>, %arg13: memref<1x2xf32, #tpu.memory_space<smem>>, %arg14: memref<2x128xf32, #tpu.memory_space<vmem>>) attributes {dimension_semantics = [#tpu.dimension_semantics<parallel>], iteration_bounds = array<i64: 1>, scalar_prefetch = 0 : i64, scratch_operands = 0 : i64, tpu.core_type = #tpu.core_type<tc>, window_params = [{transform_indices = @transform_0, window_bounds = array<i64: 32, 128>}, {transform_indices = @transform_1, window_bounds = array<i64: 8, 128>}, {pipeline_mode = #tpu.pipeline_mode<synchronous>, transform_indices = @transform_2, window_bounds = array<i64: 512, 32>}, {pipeline_mode = #tpu.pipeline_mode<synchronous>, transform_indices = @transform_3, window_bounds = array<i64: 512, 1>}, {pipeline_mode = #tpu.pipeline_mode<synchronous>, transform_indices = @transform_4, window_bounds = array<i64: 256, 256>}, {pipeline_mode = #tpu.pipeline_mode<synchronous>, transform_indices = @transform_5, window_bounds = array<i64: 256, 1>}, {pipeline_mode = #tpu.pipeline_mode<synchronous>, transform_indices = @transform_6, window_bounds = array<i64: 256, 256>}, {pipeline_mode = #tpu.pipeline_mode<synchronous>, transform_indices = @transform_7, window_bounds = array<i64: 256, 1>}, {pipeline_mode = #tpu.pipeline_mode<synchronous>, transform_indices = @transform_8, window_bounds = array<i64: 8, 256>}, {pipeline_mode = #tpu.pipeline_mode<synchronous>, transform_indices = @transform_9, window_bounds = array<i64: 8, 1>}, {pipeline_mode = #tpu.pipeline_mode<synchronous>, transform_indices = @transform_10, window_bounds = array<i64: 256, 1>}, {pipeline_mode = #tpu.pipeline_mode<synchronous>, transform_indices = @transform_11, window_bounds = array<i64: 8, 1>}, {transform_indices = @transform_12, window_bounds = array<i64: 1, 2>}, {transform_indices = @transform_13, window_bounds = array<i64: 2, 128>}]} {
    %c0 = arith.constant 0 : index
    %c0_0 = arith.constant 0 : index
    %0 = vector.load %arg1[%c0, %c0_0] : memref<32x128xf32, #tpu.memory_space<vmem>>, vector<32x128xf32>
    %1 = arith.truncf %0 : vector<32x128xf32> to vector<32x128xbf16>
    %c0_1 = arith.constant 0 : index
    %c0_2 = arith.constant 0 : index
    %2 = vector.load %arg3[%c0_1, %c0_2] : memref<512x32xbf16, #tpu.memory_space<vmem>>, vector<512x32xbf16>
    %cst = arith.constant dense<0.000000e+00> : vector<512x128xf32>
    %3 = tpu.matmul %2, %1, %cst {dimension_numbers = #tpu.dot_dimension_numbers<[1], [0], [0], [1], [0, 0, 1, 1], [], []>} : vector<512x32xbf16>, vector<32x128xbf16>, vector<512x128xf32> -> vector<512x128xf32>
    %c0_3 = arith.constant 0 : index
    %c0_4 = arith.constant 0 : index
    %4 = vector.load %arg4[%c0_3, %c0_4] : memref<512x1xf32, #tpu.memory_space<vmem>>, vector<512x1xf32>
    %5 = vector.broadcast %4 : vector<512x1xf32> to vector<512x128xf32>
    %6 = arith.addf %3, %5 : vector<512x128xf32>
    %7 = math.tanh %6 : vector<512x128xf32>
    %8 = arith.truncf %7 : vector<512x128xf32> to vector<512x128xbf16>
    %9 = vector.extract_strided_slice %8 {offsets = [0, 0], sizes = [256, 128], strides = [1, 1]} : vector<512x128xbf16> to vector<256x128xbf16>
    %10 = vector.extract_strided_slice %8 {offsets = [256, 0], sizes = [256, 128], strides = [1, 1]} : vector<512x128xbf16> to vector<256x128xbf16>
    %c0_5 = arith.constant 0 : index
    %c0_6 = arith.constant 0 : index
    %11 = vector.load %arg5[%c0_5, %c0_6] : memref<256x256xbf16, #tpu.memory_space<vmem>>, vector<256x256xbf16>
    %cst_7 = arith.constant dense<0.000000e+00> : vector<256x128xf32>
    %12 = tpu.matmul %11, %9, %cst_7 {dimension_numbers = #tpu.dot_dimension_numbers<[1], [0], [0], [1], [0, 0, 1, 1], [], []>} : vector<256x256xbf16>, vector<256x128xbf16>, vector<256x128xf32> -> vector<256x128xf32>
    %c0_8 = arith.constant 0 : index
    %c0_9 = arith.constant 0 : index
    %13 = vector.load %arg6[%c0_8, %c0_9] : memref<256x1xf32, #tpu.memory_space<vmem>>, vector<256x1xf32>
    %14 = vector.broadcast %13 : vector<256x1xf32> to vector<256x128xf32>
    %15 = arith.addf %12, %14 : vector<256x128xf32>
    %16 = math.tanh %15 : vector<256x128xf32>
    %c0_10 = arith.constant 0 : index
    %c0_11 = arith.constant 0 : index
    %17 = vector.load %arg7[%c0_10, %c0_11] : memref<256x256xbf16, #tpu.memory_space<vmem>>, vector<256x256xbf16>
    %cst_12 = arith.constant dense<0.000000e+00> : vector<256x128xf32>
    %18 = tpu.matmul %17, %10, %cst_12 {dimension_numbers = #tpu.dot_dimension_numbers<[1], [0], [0], [1], [0, 0, 1, 1], [], []>} : vector<256x256xbf16>, vector<256x128xbf16>, vector<256x128xf32> -> vector<256x128xf32>
    %c0_13 = arith.constant 0 : index
    %c0_14 = arith.constant 0 : index
    %19 = vector.load %arg8[%c0_13, %c0_14] : memref<256x1xf32, #tpu.memory_space<vmem>>, vector<256x1xf32>
    %20 = vector.broadcast %19 : vector<256x1xf32> to vector<256x128xf32>
    %21 = arith.addf %18, %20 : vector<256x128xf32>
    %22 = math.tanh %21 : vector<256x128xf32>
    %c0_15 = arith.constant 0 : index
    %c0_16 = arith.constant 0 : index
    %23 = vector.load %arg9[%c0_15, %c0_16] : memref<8x256xbf16, #tpu.memory_space<vmem>>, vector<8x256xbf16>
    %24 = arith.truncf %16 : vector<256x128xf32> to vector<256x128xbf16>
    %cst_17 = arith.constant dense<0.000000e+00> : vector<8x128xf32>
    %25 = tpu.matmul %23, %24, %cst_17 {dimension_numbers = #tpu.dot_dimension_numbers<[1], [0], [0], [1], [0, 0, 1, 1], [], []>} : vector<8x256xbf16>, vector<256x128xbf16>, vector<8x128xf32> -> vector<8x128xf32>
    %c0_18 = arith.constant 0 : index
    %c0_19 = arith.constant 0 : index
    %26 = vector.load %arg10[%c0_18, %c0_19] : memref<8x1xf32, #tpu.memory_space<vmem>>, vector<8x1xf32>
    %27 = vector.broadcast %26 : vector<8x1xf32> to vector<8x128xf32>
    %28 = arith.addf %25, %27 : vector<8x128xf32>
    %29 = math.tanh %28 : vector<8x128xf32>
    %c0_20 = arith.constant 0 : index
    %c0_21 = arith.constant 0 : index
    %30 = vector.load %arg11[%c0_20, %c0_21] : memref<256x1xf32, #tpu.memory_space<vmem>>, vector<256x1xf32>
    %31 = vector.broadcast %30 : vector<256x1xf32> to vector<256x128xf32>
    %32 = arith.mulf %31, %22 : vector<256x128xf32>
    %cst_22 = arith.constant dense<0.000000e+00> : vector<128xf32>
    %33 = vector.multi_reduction <add>, %32, %cst_22 [0] : vector<256x128xf32> to vector<128xf32>
    %34 = vector.shape_cast %33 : vector<128xf32> to vector<1x128xf32>
    %c0_23 = arith.constant 0 : index
    %c1 = arith.constant 1 : index
    %35 = memref.load %arg13[%c0_23, %c1] : memref<1x2xf32, #tpu.memory_space<smem>>
    %36 = vector.broadcast %35 : f32 to vector<1x128xf32>
    %37 = arith.addf %34, %36 : vector<1x128xf32>
    %c0_24 = arith.constant 0 : index
    %c0_25 = arith.constant 0 : index
    %38 = vector.load %arg2[%c0_24, %c0_25] : memref<8x128xf32, #tpu.memory_space<vmem>>, vector<8x128xf32>
    %39 = arith.subf %38, %29 : vector<8x128xf32>
    %40 = arith.mulf %39, %39 : vector<8x128xf32>
    %c0_26 = arith.constant 0 : index
    %c0_27 = arith.constant 0 : index
    %41 = vector.load %arg12[%c0_26, %c0_27] : memref<8x1xf32, #tpu.memory_space<vmem>>, vector<8x1xf32>
    %42 = vector.broadcast %41 : vector<8x1xf32> to vector<8x128xf32>
    %43 = arith.mulf %40, %42 : vector<8x128xf32>
    %cst_28 = arith.constant dense<0.000000e+00> : vector<128xf32>
    %44 = vector.multi_reduction <add>, %43, %cst_28 [0] : vector<8x128xf32> to vector<128xf32>
    %45 = vector.shape_cast %44 : vector<128xf32> to vector<1x128xf32>
    %c0_29 = arith.constant 0 : index
    %c0_30 = arith.constant 0 : index
    %46 = memref.load %arg13[%c0_29, %c0_30] : memref<1x2xf32, #tpu.memory_space<smem>>
    %cst_31 = arith.constant 5.000000e-01 : f32
    %47 = vector.broadcast %cst_31 : f32 to vector<1x128xf32>
    %48 = arith.mulf %47, %45 : vector<1x128xf32>
    %49 = vector.broadcast %46 : f32 to vector<1x128xf32>
    %50 = arith.subf %49, %48 : vector<1x128xf32>
    %c0_32 = arith.constant 0 : index
    %c0_33 = arith.constant 0 : index
    %51 = vector.load %arg14[%c0_32, %c0_33] : memref<2x128xf32, #tpu.memory_space<vmem>>, vector<1x128xf32>
    tpu.vector_store %arg14[%c0_32, %c0_33], %50 {strides = array<i32>} : memref<2x128xf32, #tpu.memory_space<vmem>>, vector<1x128xf32>,
    %c1_34 = arith.constant 1 : index
    %c0_35 = arith.constant 0 : index
    %52 = vector.load %arg14[%c1_34, %c0_35] : memref<2x128xf32, #tpu.memory_space<vmem>>, vector<1x128xf32>
    tpu.vector_store %arg14[%c1_34, %c0_35], %37 {strides = array<i32>} : memref<2x128xf32, #tpu.memory_space<vmem>>, vector<1x128xf32>,
    return
  }
  func.func @transform_0(%arg0: i32) -> (i32, i32) {
    %c0_i32 = arith.constant 0 : i32
    %c0_i32_0 = arith.constant 0 : i32
    return %c0_i32, %arg0 : i32, i32
  }
  func.func @transform_1(%arg0: i32) -> (i32, i32) {
    %c0_i32 = arith.constant 0 : i32
    %c0_i32_0 = arith.constant 0 : i32
    return %c0_i32, %arg0 : i32, i32
  }
  func.func @transform_2(%arg0: i32) -> (i32, i32) {
    %c0_i32 = arith.constant 0 : i32
    %c0_i32_0 = arith.constant 0 : i32
    %c0_i32_1 = arith.constant 0 : i32
    return %c0_i32, %c0_i32_0 : i32, i32
  }
  func.func @transform_3(%arg0: i32) -> (i32, i32) {
    %c0_i32 = arith.constant 0 : i32
    %c0_i32_0 = arith.constant 0 : i32
    %c0_i32_1 = arith.constant 0 : i32
    return %c0_i32, %c0_i32_0 : i32, i32
  }
  func.func @transform_4(%arg0: i32) -> (i32, i32) {
    %c0_i32 = arith.constant 0 : i32
    %c0_i32_0 = arith.constant 0 : i32
    %c0_i32_1 = arith.constant 0 : i32
    return %c0_i32, %c0_i32_0 : i32, i32
  }
  func.func @transform_5(%arg0: i32) -> (i32, i32) {
    %c0_i32 = arith.constant 0 : i32
    %c0_i32_0 = arith.constant 0 : i32
    %c0_i32_1 = arith.constant 0 : i32
    return %c0_i32, %c0_i32_0 : i32, i32
  }
  func.func @transform_6(%arg0: i32) -> (i32, i32) {
    %c0_i32 = arith.constant 0 : i32
    %c0_i32_0 = arith.constant 0 : i32
    %c0_i32_1 = arith.constant 0 : i32
    return %c0_i32, %c0_i32_0 : i32, i32
  }
  func.func @transform_7(%arg0: i32) -> (i32, i32) {
    %c0_i32 = arith.constant 0 : i32
    %c0_i32_0 = arith.constant 0 : i32
    %c0_i32_1 = arith.constant 0 : i32
    return %c0_i32, %c0_i32_0 : i32, i32
  }
  func.func @transform_8(%arg0: i32) -> (i32, i32) {
    %c0_i32 = arith.constant 0 : i32
    %c0_i32_0 = arith.constant 0 : i32
    %c0_i32_1 = arith.constant 0 : i32
    return %c0_i32, %c0_i32_0 : i32, i32
  }
  func.func @transform_9(%arg0: i32) -> (i32, i32) {
    %c0_i32 = arith.constant 0 : i32
    %c0_i32_0 = arith.constant 0 : i32
    %c0_i32_1 = arith.constant 0 : i32
    return %c0_i32, %c0_i32_0 : i32, i32
  }
  func.func @transform_10(%arg0: i32) -> (i32, i32) {
    %c0_i32 = arith.constant 0 : i32
    %c0_i32_0 = arith.constant 0 : i32
    %c0_i32_1 = arith.constant 0 : i32
    return %c0_i32, %c0_i32_0 : i32, i32
  }
  func.func @transform_11(%arg0: i32) -> (i32, i32) {
    %c0_i32 = arith.constant 0 : i32
    %c0_i32_0 = arith.constant 0 : i32
    %c0_i32_1 = arith.constant 0 : i32
    return %c0_i32, %c0_i32_0 : i32, i32
  }
  func.func @transform_12(%arg0: i32) -> (i32, i32) {
    %c0_i32 = arith.constant 0 : i32
    %c0_i32_0 = arith.constant 0 : i32
    %c0_i32_1 = arith.constant 0 : i32
    return %c0_i32, %c0_i32_0 : i32, i32
  }
  func.func @transform_13(%arg0: i32) -> (i32, i32) {
    %c0_i32 = arith.constant 0 : i32
    %c0_i32_0 = arith.constant 0 : i32
    return %c0_i32, %arg0 : i32, i32
  }
}

</mosaic_0001>

<bundles_post_ra>
// kernel: tpu_custom_call.1
= control target key start
LH: loop header
LB: loop body
LE: loop exit
PB: predicated region body
PF: predicated region fallthrough
CT: control target
= control target key end

     0   :  { %18 = vsyncpa [#allocation4], 0  ;;  %s5397_s0 = inlined_call_operand.vmem [shape: f32[32,128], index: 0, kind: input, shape index: {}]   ;;  %s5398_s1 = inlined_call_operand.vmem [shape: f32[8,128], index: 1, kind: input, shape index: {}]   ;;  %s5399_s2 = inlined_call_operand.vmem [shape: bf16[512,32], index: 2, kind: input, shape index: {}]   ;;  %s5400_s3 = inlined_call_operand.vmem [shape: f32[512,1], index: 3, kind: input, shape index: {}]   ;;  %s5401_s4 = inlined_call_operand.vmem [shape: bf16[256,256], index: 4, kind: input, shape index: {}]   ;;  %s5402_s5 = inlined_call_operand.vmem [shape: f32[256,1], index: 5, kind: input, shape index: {}]   ;;  %s5403_s6 = inlined_call_operand.vmem [shape: bf16[256,256], index: 6, kind: input, shape index: {}]   ;;  %s5404_s7 = inlined_call_operand.vmem [shape: f32[256,1], index: 7, kind: input, shape index: {}]   ;;  %s5405_s8 = inlined_call_operand.vmem [shape: bf16[8,256], index: 8, kind: input, shape index: {}]   ;;  %s5406_s9 = inlined_call_operand.vmem [shape: f32[8,1], index: 9, kind: input, shape index: {}]   ;;  %s5407_s10 = inlined_call_operand.vmem [shape: f32[256,1], index: 10, kind: input, shape index: {}]   ;;  %s5408_s11 = inlined_call_operand.vmem [shape: f32[8,1], index: 11, kind: input, shape index: {}]   ;;  %s5409_s12 = inlined_call_operand.vmem [shape: f32[1,2], index: 12, kind: input, shape index: {}]   ;;  %s5410_s13 = inlined_call_operand.hbm [shape: f32[2,128], index: 13, kind: output, shape index: {}]  }
   0x1   :  { %19 = vsyncpa [#allocation3], 0  ;;  %s49_s27 = sshll.u32 %s5409_s12, 4  ;;  %s3634_s28 = smov [#allocation2]   ;;  %s50_s27 = int_to_ptr.vmem [resolvable:$true] %s49_s27 }
   0x2   :  { %52 = dma.vmem_to_smem %s50_s27, 16, %s3634_s28, [#allocation4]  }
   0x3   :  { %3630 = dma.done.wait [#allocation4], 16  }
   0x4   :  { %3631 = vsyncadd [#allocation4], 4294967280 }
   0x5   :  { %57 = sfence }
   0x6   :  { %v133_v0 = vld [vmem:[%s5400_s3 + $0x20] sm:$0xff]  ;;  %v131_v1 = vld [vmem:[%s5400_s3 + $0x10] sm:$0xff]  ;;  %v3635_v3 = vmov 0   ;;  %v62_v5 = vld [vmem:[%s5397_s0 + $0x18] sm:$0xff]  ;;  %vm673_vm0 = vcmask 261120   ;;  %s2784_s23 = sld [smem:[#allocation2]] }
   0x7   :  { %v129_v2 = vld [vmem:[%s5400_s3] sm:$0xff]  ;;  %3335 = vset.pattern.permute.xlu2 %v3635_v3  ;;  %3334 = vset.pattern.permute.xlu1 %v3635_v3  ;;  %v61_v4 = vld [vmem:[%s5397_s0 + $0x10] sm:$0xff]  ;;  %v60_v8 = vld [vmem:[%s5397_s0 + $0x8] sm:$0xff] }
   0x8   :  { %v59_v6 = vld [vmem:[%s5397_s0] sm:$0xff]  ;;  %3333 = vset.pattern.permute.xlu0 %v3635_v3  ;;  %215 = vperm.xlu2 %3335, %v133_v0   ;;  %v64_v7 = vpack.c.bf16 %v62_v5, %v61_v4  ;;  %v134_v10 = vld [vmem:[%s5400_s3 + $0x28] sm:$0xff]  ;;  %v132_v11 = vld [vmem:[%s5400_s3 + $0x18] sm:$0xff] }
   0x9   :  { %205 = vperm.xlu1 %3334, %v131_v1   ;;  %195 = vperm.xlu0 %3333, %v129_v2   ;;  %v63_v9 = vpack.c.bf16 %v60_v8, %v59_v6  ;;  %v130_v12 = vld [vmem:[%s5400_s3 + $0x8] sm:$0xff]  ;;  %v3224_v13 = vld [vmem:[%s5399_s2] sm:$0xff]  ;;  %v3250_v14 = vld [vmem:[%s5399_s2 + $0xd0] sm:$0xff] }
   0xa   :  { %776 = vmatpush.bf16.msra.mxu0 %v64_v7  ;;  %3320 = vmatpush.bf16.msra.mxu3 %v64_v7  ;;  %v137_v15 = vld [vmem:[%s5400_s3 + $0x40] sm:$0xff]  ;;  %v136_v16 = vld [vmem:[%s5400_s3 + $0x38] sm:$0xff]  ;;  %v135_v17 = vld [vmem:[%s5400_s3 + $0x30] sm:$0xff] }
   0xb   :  { %v140_v18 = vld [vmem:[%s5400_s3 + $0x58] sm:$0xff]  ;;  %v139_v19 = vld [vmem:[%s5400_s3 + $0x50] sm:$0xff]  ;;  %v138_v20 = vld [vmem:[%s5400_s3 + $0x48] sm:$0xff] }
   0xc   :  { %v3225_v21 = vld [vmem:[%s5399_s2 + $0x8] sm:$0xff]  ;;  %v3251_v22 = vld [vmem:[%s5399_s2 + $0xd8] sm:$0xff]  ;;  %v143_v23 = vld [vmem:[%s5400_s3 + $0x70] sm:$0xff] }
   0xd   :  { %v142_v24 = vld [vmem:[%s5400_s3 + $0x68] sm:$0xff]  ;;  %v141_v25 = vld [vmem:[%s5400_s3 + $0x60] sm:$0xff]  ;;  %v144_v28 = vld [vmem:[%s5400_s3 + $0x78] sm:$0xff] }
   0xe   :  { %777 = vmatpush.bf16.msra.mxu0 %v63_v9  ;;  %3321 = vmatpush.bf16.msra.mxu3 %v63_v9  ;;  %v146_v26 = vld [vmem:[%s5400_s3 + $0x88] sm:$0xff]  ;;  %v145_v27 = vld [vmem:[%s5400_s3 + $0x80] sm:$0xff]  ;;  %v3226_v29 = vld [vmem:[%s5399_s2 + $0x10] sm:$0xff] }
   0xf   :  { %v3252_v30 = vld [vmem:[%s5399_s2 + $0xe0] sm:$0xff]  ;;  %v148_v32 = vld [vmem:[%s5400_s3 + $0x98] sm:$0xff]  ;;  %v147_v33 = vld [vmem:[%s5400_s3 + $0x90] sm:$0xff] }
  0x10   :  { %220 = vperm.xlu2 %3335, %v134_v10   ;;  %v149_v31 = vld [vmem:[%s5400_s3 + $0xa0] sm:$0xff]  ;;  %v152_v34 = vld [vmem:[%s5400_s3 + $0xb8] sm:$0xff]  ;;  %v151_v35 = vld [vmem:[%s5400_s3 + $0xb0] sm:$0xff] }
  0x11   :  { %210 = vperm.xlu1 %3334, %v132_v11   ;;  %200 = vperm.xlu0 %3333, %v130_v12   ;;  %v150_v36 = vld [vmem:[%s5400_s3 + $0xa8] sm:$0xff]  ;;  %v3227_v37 = vld [vmem:[%s5399_s2 + $0x18] sm:$0xff]  ;;  %v155_v39 = vld [vmem:[%s5400_s3 + $0xd0] sm:$0xff] }
  0x12   :  { %2935 = vmatmul.msk.bf16.vlgmr.msra.gmra.mxu0 %vm673_vm0, %v3224_v13  ;;  %2961 = vmatmul.msk.bf16.vlgmr.msra.gmra.mxu3 %vm673_vm0, %v3250_v14  ;;  %v3253_v38 = vld [vmem:[%s5399_s2 + $0xe8] sm:$0xff]  ;;  %v153_v41 = vld [vmem:[%s5400_s3 + $0xc0] sm:$0xff]  ;;  %v156_v44 = vld [vmem:[%s5400_s3 + $0xd8] sm:$0xff] }
  0x13   :  { %v154_v40 = vld [vmem:[%s5400_s3 + $0xc8] sm:$0xff]  ;;  %v157_v43 = vld [vmem:[%s5400_s3 + $0xe0] sm:$0xff]  ;;  %v3254_v46 = vld [vmem:[%s5399_s2 + $0xf0] sm:$0xff] }
  0x14   :  { %v158_v42 = vld [vmem:[%s5400_s3 + $0xe8] sm:$0xff]  ;;  %v3228_v45 = vld [vmem:[%s5399_s2 + $0x20] sm:$0xff]  ;;  %v160_v48 = vld [vmem:[%s5400_s3 + $0xf8] sm:$0xff] }
  0x15   :  { %v161_v47 = vld [vmem:[%s5400_s3 + $0x100] sm:$0xff]  ;;  %v159_v49 = vld [vmem:[%s5400_s3 + $0xf0] sm:$0xff]  ;;  %v164_v50 = vld [vmem:[%s5400_s3 + $0x118] sm:$0xff] }
  0x16   :  { %v163_v51 = vld [vmem:[%s5400_s3 + $0x110] sm:$0xff]  ;;  %v162_v52 = vld [vmem:[%s5400_s3 + $0x108] sm:$0xff]  ;;  %v3255_v54 = vld [vmem:[%s5399_s2 + $0xf8] sm:$0xff] }
  0x17   :  { %v3229_v53 = vld [vmem:[%s5399_s2 + $0x28] sm:$0xff]  ;;  %v167_v56 = vld [vmem:[%s5400_s3 + $0x130] sm:$0xff]  ;;  %v165_v58 = vld [vmem:[%s5400_s3 + $0x120] sm:$0xff] }
  0x18   :  { %235 = vperm.xlu2 %3335, %v137_v15   ;;  %v166_v57 = vld [vmem:[%s5400_s3 + $0x128] sm:$0xff]  ;;  %v169_v61 = vld [vmem:[%s5400_s3 + $0x140] sm:$0xff]  ;;  %v168_v62 = vld [vmem:[%s5400_s3 + $0x138] sm:$0xff] }
  0x19   :  { %230 = vperm.xlu1 %3334, %v136_v16   ;;  %225 = vperm.xlu0 %3333, %v135_v17   ;;  %v170_v60 = vld [vmem:[%s5400_s3 + $0x148] sm:$0xff]  ;;  %v3230_v63 = vld [vmem:[%s5399_s2 + $0x30] sm:$0xff]  ;;  %v173_v1 = vld [vmem:[%s5400_s3 + $0x160] sm:$0xff] }
  0x1a   :  { %v172_v2 = vld [vmem:[%s5400_s3 + $0x158] sm:$0xff]  ;;  %v171_v3 = vld [vmem:[%s5400_s3 + $0x150] sm:$0xff]  ;;  %v174_v9 = vld [vmem:[%s5400_s3 + $0x168] sm:$0xff] }
  0x1b   :  { %v176_v7 = vld [vmem:[%s5400_s3 + $0x178] sm:$0xff]  ;;  %v175_v8 = vld [vmem:[%s5400_s3 + $0x170] sm:$0xff]  ;;  %v178_v15 = vld [vmem:[%s5400_s3 + $0x188] sm:$0xff] }
  0x1c   :  { %v3231_v10 = vld [vmem:[%s5399_s2 + $0x38] sm:$0xff]  ;;  %v179_v14 = vld [vmem:[%s5400_s3 + $0x190] sm:$0xff]  ;;  %v177_v16 = vld [vmem:[%s5400_s3 + $0x180] sm:$0xff] }
  0x20   :  { %250 = vperm.xlu2 %3335, %v140_v18  }
  0x21   :  { %245 = vperm.xlu1 %3334, %v139_v19   ;;  %240 = vperm.xlu0 %3333, %v138_v20   ;;  %v182_v20 = vld [vmem:[%s5400_s3 + $0x1a8] sm:$0xff] }
  0x22   :  { %2936 = vmatmul.msk.bf16.gmra.mxu0 %vm673_vm0, %v3225_v21  ;;  %2962 = vmatmul.msk.bf16.gmra.mxu3 %vm673_vm0, %v3251_v22  ;;  %v181_v21 = vld [vmem:[%s5400_s3 + $0x1a0] sm:$0xff]  ;;  %v180_v22 = vld [vmem:[%s5400_s3 + $0x198] sm:$0xff] }
  0x28   :  { %265 = vperm.xlu2 %3335, %v143_v23   ;;  %v3232_v23 = vld [vmem:[%s5399_s2 + $0x40] sm:$0xff] }
  0x29   :  { %260 = vperm.xlu1 %3334, %v142_v24   ;;  %255 = vperm.xlu0 %3333, %v141_v25  }
  0x30   :  { %280 = vperm.xlu2 %3335, %v146_v26  }
  0x31   :  { %275 = vperm.xlu1 %3334, %v145_v27   ;;  %270 = vperm.xlu0 %3333, %v144_v28  }
  0x32   :  { %2937 = vmatmul.msk.bf16.gmra.mxu0 %vm673_vm0, %v3226_v29  ;;  %2963 = vmatmul.msk.bf16.gmra.mxu3 %vm673_vm0, %v3252_v30  ;;  %v185_v29 = vld [vmem:[%s5400_s3 + $0x1c0] sm:$0xff]  ;;  %v184_v30 = vld [vmem:[%s5400_s3 + $0x1b8] sm:$0xff] }
  0x38   :  { %295 = vperm.xlu2 %3335, %v149_v31   ;;  %v183_v31 = vld [vmem:[%s5400_s3 + $0x1b0] sm:$0xff] }
  0x39   :  { %290 = vperm.xlu1 %3334, %v148_v32   ;;  %285 = vperm.xlu0 %3333, %v147_v33  }
  0x40   :  { %310 = vperm.xlu2 %3335, %v152_v34  }
  0x41   :  { %305 = vperm.xlu1 %3334, %v151_v35   ;;  %300 = vperm.xlu0 %3333, %v150_v36  }
  0x42   :  { %2938 = vmatmul.msk.bf16.gmra.mxu0 %vm673_vm0, %v3227_v37  ;;  %2964 = vmatmul.msk.bf16.gmra.mxu3 %vm673_vm0, %v3253_v38  ;;  %v188_v38 = vld [vmem:[%s5400_s3 + $0x1d8] sm:$0xff] }
  0x48   :  { %325 = vperm.xlu2 %3335, %v155_v39   ;;  %v187_v39 = vld [vmem:[%s5400_s3 + $0x1d0] sm:$0xff] }
  0x49   :  { %320 = vperm.xlu1 %3334, %v154_v40   ;;  %315 = vperm.xlu0 %3333, %v153_v41   ;;  %v186_v40 = vld [vmem:[%s5400_s3 + $0x1c8] sm:$0xff] }
  0x4a   :  { %v3233_v41 = vld [vmem:[%s5399_s2 + $0x48] sm:$0xff] }
  0x50   :  { %340 = vperm.xlu2 %3335, %v158_v42  }
  0x51   :  { %335 = vperm.xlu1 %3334, %v157_v43   ;;  %330 = vperm.xlu0 %3333, %v156_v44  }
  0x52   :  { %2939 = vmatmul.msk.bf16.gmra.mxu0 %vm673_vm0, %v3228_v45  ;;  %2965 = vmatmul.msk.bf16.gmra.mxu3 %vm673_vm0, %v3254_v46 }
  0x58   :  { %355 = vperm.xlu2 %3335, %v161_v47  }
  0x59   :  { %350 = vperm.xlu1 %3334, %v160_v48   ;;  %345 = vperm.xlu0 %3333, %v159_v49  }
  0x60   :  { %370 = vperm.xlu2 %3335, %v164_v50  }
  0x61   :  { %365 = vperm.xlu1 %3334, %v163_v51   ;;  %360 = vperm.xlu0 %3333, %v162_v52   ;;  %v191_v52 = vld [vmem:[%s5400_s3 + $0x1f0] sm:$0xff] }
  0x62   :  { %2940 = vmatmul.msk.bf16.gmra.mxu0 %vm673_vm0, %v3229_v53  ;;  %v3877_v55 = vpop.permute.xlu2 %215  ;;  %2966 = vmatmul.msk.bf16.gmra.mxu3 %vm673_vm0, %v3255_v54  ;;  %v190_v54 = vld [vmem:[%s5400_s3 + $0x1e8] sm:$0xff] }
  0x68   :  { %385 = vperm.xlu2 %3335, %v167_v56   ;;  %v189_v56 = vld [vmem:[%s5400_s3 + $0x1e0] sm:$0xff] }
  0x69   :  { %380 = vperm.xlu1 %3334, %v166_v57   ;;  %375 = vperm.xlu0 %3333, %v165_v58  }
  0x6a   :  { %v3889_v59 = vpop.permute.xlu2 %220 }
  0x70   :  { %400 = vperm.xlu2 %3335, %v170_v60  }
  0x71   :  { %395 = vperm.xlu1 %3334, %v169_v61   ;;  %390 = vperm.xlu0 %3333, %v168_v62  }
  0x72   :  { %2941 = vmatmul.msk.bf16.gmra.mxu0 %vm673_vm0, %v3230_v63  ;;  %v3904_v0 = vpop.permute.xlu2 %235 }
  0x78   :  { %415 = vperm.xlu2 %3335, %v173_v1   ;;  %v1100_v1 = vld [vmem:[%s5402_s5 + $0x8] sm:$0xff] }
  0x79   :  { %410 = vperm.xlu1 %3334, %v172_v2   ;;  %405 = vperm.xlu0 %3333, %v171_v3   ;;  %v1099_v2 = vld [vmem:[%s5402_s5] sm:$0xff]  ;;  %v192_v3 = vld [vmem:[%s5400_s3 + $0x1f8] sm:$0xff] }
  0x7a   :  { %v3915_v4 = vpop.permute.xlu2 %250 }
  0x7b   :  { %v206_v5 = vpop.permute.xlu1 %205  ;;  %v196_v6 = vpop.permute.xlu0 %195 }
  0x80   :  { %430 = vperm.xlu2 %3335, %v176_v7  }
  0x81   :  { %425 = vperm.xlu1 %3334, %v175_v8   ;;  %420 = vperm.xlu0 %3333, %v174_v9  }
  0x82   :  { %2942 = vmatmul.msk.bf16.gmra.mxu0 %vm673_vm0, %v3231_v10  ;;  %v3930_v11 = vpop.permute.xlu2 %265 }
  0x83   :  { %v211_v12 = vpop.permute.xlu1 %210  ;;  %v201_v13 = vpop.permute.xlu0 %200 }
  0x88   :  { %445 = vperm.xlu2 %3335, %v179_v14  }
  0x89   :  { %440 = vperm.xlu1 %3334, %v178_v15   ;;  %435 = vperm.xlu0 %3333, %v177_v16  }
  0x8a   :  { %v3941_v17 = vpop.permute.xlu2 %280 }
  0x8b   :  { %v3943_v18 = vpop.permute.xlu1 %230  ;;  %v3945_v19 = vpop.permute.xlu0 %225 }
  0x8f   :  { %v779_v24 = vpop.f32.mrf.mxu0 }
  0x90   :  { %460 = vperm.xlu2 %3335, %v182_v20   ;;  %v780_v25 = vadd.f32 %v779_v24, %v196_v6  ;;  %v1103_v20 = vld [vmem:[%s5402_s5 + $0x20] sm:$0xff] }
  0x91   :  { %455 = vperm.xlu1 %3334, %v181_v21   ;;  %450 = vperm.xlu0 %3333, %v180_v22  }
  0x92   :  { %2943 = vmatmul.msk.bf16.gmra.mxu0 %vm673_vm0, %v3232_v23  ;;  %v3960_v26 = vpop.permute.xlu2 %295  ;;  %3336 = vtanh.f32 %v780_v25  ;;  %v1101_v23 = vld [vmem:[%s5402_s5 + $0x10] sm:$0xff] }
  0x93   :  { %v3962_v27 = vpop.permute.xlu1 %245  ;;  %v3964_v28 = vpop.permute.xlu0 %240 }
  0x95   :  { %v4035_v16 = vpop.f32.mrf.mxu3 }
  0x97   :  { %v781_v32 = vpop.f32.mrf.mxu0 }
  0x98   :  { %v782_v33 = vadd.f32 %v781_v32, %v201_v13  ;;  %475 = vperm.xlu2 %3335, %v185_v29   ;;  %v3337_v37 = vpop.eup %3336  ;;  %v1106_v32 = vld [vmem:[%s5402_s5 + $0x38] sm:$0xff] }
  0x99   :  { %470 = vperm.xlu1 %3334, %v184_v30   ;;  %465 = vperm.xlu0 %3333, %v183_v31   ;;  %v1003_v42 = vpack.c.bf16 %v3337_v37, %v3337_v37  ;;  %v1105_v37 = vld [vmem:[%s5402_s5 + $0x30] sm:$0xff] }
  0x9a   :  { %3338 = vtanh.f32 %v782_v33  ;;  %v3975_v34 = vpop.permute.xlu2 %310 }
  0x9b   :  { %v3977_v35 = vpop.permute.xlu1 %260  ;;  %v3979_v36 = vpop.permute.xlu0 %255  ;;  %v1483_v48 = vunpack.c.l.b16 %v1003_v42 }
  0x9d   :  { %v4058_v33 = vpop.f32.mrf.mxu3 }
  0x9f   :  { %v784_v43 = vpop.f32.mrf.mxu0 }
  0xa0   :  { %v3339_v44 = vpop.eup %3338  ;;  %490 = vperm.xlu2 %3335, %v188_v38   ;;  %v785_v46 = vadd.f32 %v784_v43, %v206_v5  ;;  %v3234_v5 = vld [vmem:[%s5399_s2 + $0x50] sm:$0xff]  ;;  %v3235_v38 = vld [vmem:[%s5399_s2 + $0x58] sm:$0xff] }
  0xa1   :  { %485 = vperm.xlu1 %3334, %v187_v39   ;;  %480 = vperm.xlu0 %3333, %v186_v40   ;;  %v1004_v45 = vpack.c.bf16 %v3339_v44, %v3339_v44 }
  0xa2   :  { %2944 = vmatmul.msk.bf16.gmra.mxu0 %vm673_vm0, %v3233_v41  ;;  %v3994_v47 = vpop.permute.xlu2 %325  ;;  %3340 = vtanh.f32 %v785_v46 }
  0xa3   :  { %v3996_v49 = vpop.permute.xlu1 %275  ;;  %v3998_v50 = vpop.permute.xlu0 %270  ;;  %v1484_v51 = vunpack.c.l.b16 %v1004_v45 }
  0xa5   :  { %v4003_v53 = vpack.c.b16 %v1484_v51, %v1483_v48 }
  0xa7   :  { %v786_v57 = vpop.f32.mrf.mxu0 }
  0xa8   :  { %v787_v58 = vadd.f32 %v786_v57, %v211_v12  ;;  %505 = vperm.xlu2 %3335, %v191_v52   ;;  %v3341_v62 = vpop.eup %3340  ;;  %v1109_v52 = vld [vmem:[%s5402_s5 + $0x50] sm:$0xff] }
  0xa9   :  { %500 = vperm.xlu1 %3334, %v190_v54   ;;  %495 = vperm.xlu0 %3333, %v189_v56   ;;  %v1005_v6 = vpack.c.bf16 %v3341_v62, %v3341_v62  ;;  %v1108_v56 = vld [vmem:[%s5402_s5 + $0x48] sm:$0xff] }
  0xaa   :  { %3342 = vtanh.f32 %v787_v58  ;;  %v4015_v63 = vpop.permute.xlu2 %340  ;;  %v4088_v58 = vpop.f32.mrf.mxu3 }
  0xab   :  { %v4011_v60 = vpop.permute.xlu1 %290  ;;  %v4013_v61 = vpop.permute.xlu0 %285  ;;  %v1485_v12 = vunpack.c.l.b16 %v1005_v6  ;;  %v1112_v6 = vld [vmem:[%s5402_s5 + $0x68] sm:$0xff] }
  0xaf   :  { %v789_v7 = vpop.f32.mrf.mxu0 }
  0xb0   :  { %v3343_v8 = vpop.eup %3342  ;;  %1138 = vperm.xlu2 %3335, %v1100_v1   ;;  %v790_v10 = vadd.f32 %v789_v7, %v3877_v55  ;;  %v1102_v55 = vld [vmem:[%s5402_s5 + $0x18] sm:$0xff]  ;;  %v1111_v7 = vld [vmem:[%s5402_s5 + $0x60] sm:$0xff] }
  0xb1   :  { %1133 = vperm.xlu1 %3334, %v1099_v2   ;;  %510 = vperm.xlu0 %3333, %v192_v3   ;;  %v1006_v9 = vpack.c.bf16 %v3343_v8, %v3343_v8  ;;  %v3236_v8 = vld [vmem:[%s5399_s2 + $0x60] sm:$0xff] }
  0xb2   :  { %2945 = vmatmul.msk.bf16.gmra.mxu0 %vm673_vm0, %v3234_v5  ;;  %3344 = vtanh.f32 %v790_v10  ;;  %v4042_v22 = vpop.permute.xlu2 %355 }
  0xb3   :  { %v4031_v13 = vpop.permute.xlu1 %305  ;;  %v4033_v14 = vpop.permute.xlu0 %300  ;;  %v1486_v15 = vunpack.c.l.b16 %v1006_v9 }
  0xb5   :  { %v4040_v21 = vpack.c.b16 %v1486_v15, %v1485_v12 }
  0xb7   :  { %v791_v24 = vpop.f32.mrf.mxu0 }
  0xb8   :  { %v792_v25 = vadd.f32 %v791_v24, %v3889_v59  ;;  %1153 = vperm.xlu2 %3335, %v1103_v20   ;;  %v3345_v31 = vpop.eup %3344  ;;  %v1104_v59 = vld [vmem:[%s5402_s5 + $0x28] sm:$0xff]  ;;  %v4111_v20 = vpop.f32.mrf.mxu3 }
  0xb9   :  { %1148 = vperm.xlu1 %3334, %v1102_v55   ;;  %1143 = vperm.xlu0 %3333, %v1101_v23   ;;  %v1007_v39 = vpack.c.bf16 %v3345_v31, %v3345_v31 }
  0xba   :  { %3346 = vtanh.f32 %v792_v25  ;;  %v4069_v42 = vpop.permute.xlu2 %370 }
  0xbb   :  { %v4051_v29 = vpop.permute.xlu1 %320  ;;  %v4053_v30 = vpop.permute.xlu0 %315  ;;  %v1487_v45 = vunpack.c.l.b16 %v1007_v39 }
  0xbf   :  { %v794_v40 = vpop.f32.mrf.mxu0 }
  0xc0   :  { %v3347_v41 = vpop.eup %3346  ;;  %1168 = vperm.xlu2 %3335, %v1106_v32   ;;  %v795_v44 = vadd.f32 %v794_v40, %v3945_v19  ;;  %v1107_v19 = vld [vmem:[%s5402_s5 + $0x40] sm:$0xff] }
  0xc1   :  { %1163 = vperm.xlu1 %3334, %v1105_v37   ;;  %1158 = vperm.xlu0 %3333, %v1104_v59   ;;  %v1008_v43 = vpack.c.bf16 %v3347_v41, %v3347_v41  ;;  %v1115_v32 = vld [vmem:[%s5402_s5 + $0x80] sm:$0xff]  ;;  %v1114_v59 = vld [vmem:[%s5402_s5 + $0x78] sm:$0xff] }
  0xc2   :  { %2946 = vmatmul.msk.bf16.gmra.mxu0 %vm673_vm0, %v3235_v38  ;;  %3348 = vtanh.f32 %v795_v44  ;;  %v4091_v1 = vpop.permute.xlu2 %385  ;;  %v1113_v38 = vld [vmem:[%s5402_s5 + $0x70] sm:$0xff]  ;;  %v1118_v44 = vld [vmem:[%s5402_s5 + $0x98] sm:$0xff] }
  0xc3   :  { %v4073_v46 = vpop.permute.xlu1 %335  ;;  %v4075_v48 = vpop.permute.xlu0 %330  ;;  %v1488_v51 = vunpack.c.l.b16 %v1008_v43  ;;  %5411 = vst [vmem:[#allocation8_spill] sm:$0xff] %v4091_v1 }
  0xc4   :  { %v4137_v43 = vpop.f32.mrf.mxu3 }
  0xc5   :  { %v4080_v54 = vpack.c.b16 %v1488_v51, %v1487_v45  ;;  %v1117_v51 = vld [vmem:[%s5402_s5 + $0x90] sm:$0xff] }
  0xc7   :  { %v796_v57 = vpop.f32.mrf.mxu0 }
  0xc8   :  { %v797_v62 = vadd.f32 %v796_v57, %v3943_v18  ;;  %1183 = vperm.xlu2 %3335, %v1109_v52   ;;  %v3349_v5 = vpop.eup %3348  ;;  %v1110_v18 = vld [vmem:[%s5402_s5 + $0x58] sm:$0xff]  ;;  %v1116_v52 = vld [vmem:[%s5402_s5 + $0x88] sm:$0xff] }
  0xc9   :  { %1178 = vperm.xlu1 %3334, %v1108_v56   ;;  %1173 = vperm.xlu0 %3333, %v1107_v19   ;;  %v1009_v9 = vpack.c.bf16 %v3349_v5, %v3349_v5  ;;  %v3237_v56 = vld [vmem:[%s5399_s2 + $0x68] sm:$0xff]  ;;  %v1121_v5 = vld [vmem:[%s5402_s5 + $0xb0] sm:$0xff] }
  0xca   :  { %3350 = vtanh.f32 %v797_v62  ;;  %v4118_v31 = vpop.permute.xlu2 %400 }
  0xcb   :  { %v4093_v2 = vpop.permute.xlu1 %350  ;;  %v4095_v3 = vpop.permute.xlu0 %345  ;;  %v1489_v55 = vunpack.c.l.b16 %v1009_v9  ;;  %5412 = vst [vmem:[#allocation9_spill] sm:$0xff] %v4118_v31  ;;  %v1129_v31 = vld [vmem:[%s5402_s5 + $0xf0] sm:$0xff] }
  0xcf   :  { %v4109_v10 = vpop.f32.mrf.mxu0 }
  0xd0   :  { %v3351_v12 = vpop.eup %3350  ;;  %1198 = vperm.xlu2 %3335, %v1112_v6   ;;  %v4163_v6 = vpop.f32.mrf.mxu3 }
  0xd1   :  { %1193 = vperm.xlu1 %3334, %v1111_v7   ;;  %1188 = vperm.xlu0 %3333, %v1110_v18   ;;  %v1010_v15 = vpack.c.bf16 %v3351_v12, %v3351_v12  ;;  %v1120_v7 = vld [vmem:[%s5402_s5 + $0xa8] sm:$0xff]  ;;  %v1119_v18 = vld [vmem:[%s5402_s5 + $0xa0] sm:$0xff] }
  0xd2   :  { %2947 = vmatmul.msk.bf16.gmra.mxu0 %vm673_vm0, %v3236_v8  ;;  %v4142_v45 = vpop.permute.xlu2 %415 }
  0xd3   :  { %v4114_v23 = vpop.permute.xlu1 %365  ;;  %v4116_v24 = vpop.permute.xlu0 %360  ;;  %v1490_v25 = vunpack.c.l.b16 %v1010_v15  ;;  %5414 = vst [vmem:[#allocation11_spill] sm:$0xff] %v4142_v45 }
  0xd5   :  { %v4123_v37 = vpack.c.b16 %v1490_v25, %v1489_v55  ;;  %v1124_v55 = vld [vmem:[%s5402_s5 + $0xc8] sm:$0xff]  ;;  %v1123_v25 = vld [vmem:[%s5402_s5 + $0xc0] sm:$0xff] }
  0xd7   :  { %v4131_v39 = vpop.f32.mrf.mxu0 }
  0xd8   :  { %1213 = vperm.xlu2 %3335, %v1115_v32   ;;  %v1122_v32 = vld [vmem:[%s5402_s5 + $0xb8] sm:$0xff] }
  0xd9   :  { %1208 = vperm.xlu1 %3334, %v1114_v59   ;;  %1203 = vperm.xlu0 %3333, %v1113_v38   ;;  %v3238_v59 = vld [vmem:[%s5399_s2 + $0x70] sm:$0xff] }
  0xda   :  { %v4171_v9 = vpop.permute.xlu2 %430 }
  0xdb   :  { %v4133_v40 = vpop.permute.xlu1 %380  ;;  %v4135_v41 = vpop.permute.xlu0 %375  ;;  %5417 = vst [vmem:[#allocation14_spill] sm:$0xff] %v4171_v9 }
  0xdc   :  { %5413 = vst [vmem:[#allocation10_spill] sm:$0xff] %v4133_v40 }
  0xdf   :  { %v4153_v19 = vpop.f32.mrf.mxu0 }
  0xe0   :  { %1228 = vperm.xlu2 %3335, %v1118_v44   ;;  %v4189_v44 = vpop.f32.mrf.mxu3 }
  0xe1   :  { %1223 = vperm.xlu1 %3334, %v1117_v51   ;;  %1218 = vperm.xlu0 %3333, %v1116_v52  }
  0xe2   :  { %2948 = vmatmul.msk.bf16.gmra.mxu0 %vm673_vm0, %v3237_v56  ;;  %v4191_v51 = vpop.permute.xlu2 %445 }
  0xe3   :  { %v4156_v57 = vpop.permute.xlu1 %395  ;;  %v4158_v62 = vpop.permute.xlu0 %390  ;;  %5420 = vst [vmem:[#allocation17_spill] sm:$0xff] %v4191_v51 }
  0xe4   :  { %5415 = vst [vmem:[#allocation12_spill] sm:$0xff] %v4156_v57  ;;  %v1130_v57 = vld [vmem:[%s5402_s5 + $0xf8] sm:$0xff] }
  0xe5   :  { %5416 = vst [vmem:[#allocation13_spill] sm:$0xff] %v4158_v62 }
  0xe7   :  { %v806_v8 = vpop.f32.mrf.mxu0 }
  0xe8   :  { %1243 = vperm.xlu2 %3335, %v1121_v5   ;;  %v1127_v5 = vld [vmem:[%s5402_s5 + $0xe0] sm:$0xff] }
  0xe9   :  { %1238 = vperm.xlu1 %3334, %v1120_v7   ;;  %1233 = vperm.xlu0 %3333, %v1119_v18   ;;  %v1126_v7 = vld [vmem:[%s5402_s5 + $0xd8] sm:$0xff]  ;;  %v1125_v18 = vld [vmem:[%s5402_s5 + $0xd0] sm:$0xff] }
  0xea   :  { %v4213_v51 = vpop.permute.xlu2 %460 }
  0xeb   :  { %v4173_v12 = vpop.permute.xlu1 %410  ;;  %v4175_v15 = vpop.permute.xlu0 %405 }
  0xec   :  { %5418 = vst [vmem:[#allocation15_spill] sm:$0xff] %v4173_v12 }
  0xed   :  { %5419 = vst [vmem:[#allocation16_spill] sm:$0xff] %v4175_v15 }
  0xef   :  { %v809_v38 = vpop.f32.mrf.mxu0 }
  0xf0   :  { %1258 = vperm.xlu2 %3335, %v1124_v55   ;;  %v810_v12 = vadd.f32 %v809_v38, %v3979_v36  ;;  %v807_v36 = vadd.f32 %v806_v8, %v3915_v4  ;;  %v1794_v4 = vld [vmem:[%s5404_s7 + $0x28] sm:$0xff]  ;;  %v800_v8 = vadd.f32 %v4109_v10, %v3904_v0 }
  0xf1   :  { %1253 = vperm.xlu1 %3334, %v1123_v25   ;;  %1248 = vperm.xlu0 %3333, %v1122_v32   ;;  %v4207_v25 = vpop.f32.mrf.mxu3 }
  0xf2   :  { %2949 = vmatmul.msk.bf16.gmra.mxu0 %vm673_vm0, %v3238_v59 }
  0xf3   :  { %v4194_v52 = vpop.permute.xlu1 %425  ;;  %v4196_v56 = vpop.permute.xlu0 %420 }
  0xf4   :  { %5421 = vst [vmem:[#allocation18_spill] sm:$0xff] %v4194_v52 }
  0xf5   :  { %5422 = vst [vmem:[#allocation19_spill] sm:$0xff] %v4196_v56 }
  0xf7   :  { %v811_v55 = vpop.f32.mrf.mxu0 }
  0xf8   :  { %1273 = vperm.xlu2 %3335, %v1127_v5   ;;  %v1128_v5 = vld [vmem:[%s5402_s5 + $0xe8] sm:$0xff]  ;;  %v812_v9 = vadd.f32 %v811_v55, %v3977_v35  ;;  %v805_v55 = vadd.f32 %v4153_v19, %v3962_v27  ;;  %v1793_v27 = vld [vmem:[%s5404_s7 + $0x20] sm:$0xff]  ;;  %v1792_v19 = vld [vmem:[%s5404_s7 + $0x18] sm:$0xff] }
  0xf9   :  { %1268 = vperm.xlu1 %3334, %v1126_v7   ;;  %1263 = vperm.xlu0 %3333, %v1125_v18   ;;  %v3239_v7 = vld [vmem:[%s5399_s2 + $0x78] sm:$0xff]  ;;  %v4235_v45 = vpop.f32.mrf.mxu3 }
  0xfb   :  { %v4209_v32 = vpop.permute.xlu1 %440  ;;  %v4211_v59 = vpop.permute.xlu0 %435 }
  0xfc   :  { %5423 = vst [vmem:[#allocation20_spill] sm:$0xff] %v4209_v32 }
  0xfd   :  { %5424 = vst [vmem:[#allocation21_spill] sm:$0xff] %v4211_v59 }
  0xff   :  { %v814_v18 = vpop.f32.mrf.mxu0 }
 0x100   :  { %1288 = vperm.xlu2 %3335, %v1130_v57   ;;  %v815_v59 = vadd.f32 %v814_v18, %v3930_v11  ;;  %v1791_v57 = vld [vmem:[%s5404_s7 + $0x10] sm:$0xff]  ;;  %v1790_v11 = vld [vmem:[%s5404_s7 + $0x8] sm:$0xff] }
 0x101   :  { %1283 = vperm.xlu1 %3334, %v1129_v31   ;;  %1278 = vperm.xlu0 %3333, %v1128_v5   ;;  %v1789_v31 = vld [vmem:[%s5404_s7] sm:$0xff]  ;;  %v4246_v5 = vpop.permute.xlu2 %475 }
 0x102   :  { %2950 = vmatmul.msk.bf16.gmra.mxu0 %vm673_vm0, %v3239_v7  ;;  %3352 = vtanh.f32 %v815_v59 }
 0x103   :  { %v4229_v32 = vpop.permute.xlu1 %455  ;;  %v4231_v15 = vpop.permute.xlu0 %450  ;;  %3354 = vtanh.f32 %v812_v9 }
 0x104   :  { %5425 = vst [vmem:[#allocation22_spill] sm:$0xff] %v4231_v15  ;;  %3356 = vtanh.f32 %v810_v12  ;;  %v802_v15 = vadd.f32 %v4131_v39, %v3964_v28  ;;  %v3240_v28 = vld [vmem:[%s5399_s2 + $0x80] sm:$0xff]  ;;  %v931_v9 = vpop.f32.mrf.mxu3 }
 0x107   :  { %v816_v35 = vpop.f32.mrf.mxu0 }
 0x108   :  { %v817_v38 = vadd.f32 %v816_v35, %v3998_v50  ;;  %1833 = vperm.xlu2 %3335, %v1791_v57   ;;  %v3353_v18 = vpop.eup %3352 }
 0x109   :  { %1828 = vperm.xlu1 %3334, %v1790_v11   ;;  %1823 = vperm.xlu0 %3333, %v1789_v31   ;;  %v3355_v50 = vpop.eup %3354  ;;  %v1017_v12 = vpack.c.bf16 %v3353_v18, %v3353_v18  ;;  %v4272_v0 = vpop.permute.xlu2 %490 }
 0x10a   :  { %3358 = vtanh.f32 %v817_v38  ;;  %v3357_v39 = vpop.eup %3356  ;;  %v1016_v31 = vpack.c.bf16 %v3355_v50, %v3355_v50 }
 0x10b   :  { %v4252_v59 = vpop.permute.xlu1 %470  ;;  %v4254_v7 = vpop.permute.xlu0 %465  ;;  %3360 = vtanh.f32 %v807_v36  ;;  %v1015_v38 = vpack.c.bf16 %v3357_v39, %v3357_v39 }
 0x10c   :  { %3362 = vtanh.f32 %v805_v55  ;;  %v1497_v55 = vunpack.c.l.b16 %v1017_v12  ;;  %v1496_v50 = vunpack.c.l.b16 %v1016_v31  ;;  %v934_v31 = vpop.f32.mrf.mxu3 }
 0x10d   :  { %3364 = vtanh.f32 %v802_v15  ;;  %v1495_v12 = vunpack.c.l.b16 %v1015_v38 }
 0x10e   :  { %3366 = vtanh.f32 %v800_v8 }
 0x10f   :  { %v819_v57 = vpop.f32.mrf.mxu0 }
 0x110   :  { %v3359_v11 = vpop.eup %3358  ;;  %1848 = vperm.xlu2 %3335, %v1794_v4   ;;  %v820_v36 = vadd.f32 %v819_v57, %v3996_v49  ;;  %v1796_v49 = vld [vmem:[%s5404_s7 + $0x38] sm:$0xff] }
 0x111   :  { %1843 = vperm.xlu1 %3334, %v1793_v27   ;;  %1838 = vperm.xlu0 %3333, %v1792_v19   ;;  %v1018_v10 = vpack.c.bf16 %v3359_v11, %v3359_v11  ;;  %v3361_v35 = vpop.eup %3360  ;;  %v1797_v27 = vld [vmem:[%s5404_s7 + $0x40] sm:$0xff]  ;;  %v506_v1 = vpop.permute.xlu2 %505 }
 0x112   :  { %2951 = vmatmul.msk.bf16.gmra.mxu0 %vm673_vm0, %v3240_v28  ;;  %v3363_v4 = vpop.eup %3362  ;;  %v1014_v19 = vpack.c.bf16 %v3361_v35, %v3361_v35  ;;  %3368 = vtanh.f32 %v820_v36  ;;  %v1795_v28 = vld [vmem:[%s5404_s7 + $0x30] sm:$0xff]  ;;  %v1521_v35 = vpack.c.b16 %v1496_v50, %v1495_v12 }
 0x113   :  { %v4276_v56 = vpop.permute.xlu1 %485  ;;  %v4278_v18 = vpop.permute.xlu0 %480  ;;  %v1498_v15 = vunpack.c.l.b16 %v1018_v10  ;;  %v1013_v39 = vpack.c.bf16 %v3363_v4, %v3363_v4  ;;  %v1799_v50 = vld [vmem:[%s5404_s7 + $0x50] sm:$0xff] }
 0x114   :  { %v3365_v8 = vpop.eup %3364  ;;  %v1494_v36 = vunpack.c.l.b16 %v1014_v19  ;;  %v1798_v19 = vld [vmem:[%s5404_s7 + $0x48] sm:$0xff] }
 0x115   :  { %v1522_v52 = vpack.c.b16 %v1498_v15, %v1497_v55  ;;  %v3367_v11 = vpop.eup %3366  ;;  %v1012_v55 = vpack.c.bf16 %v3365_v8, %v3365_v8  ;;  %v1493_v62 = vunpack.c.l.b16 %v1013_v39  ;;  %v3241_v8 = vld [vmem:[%s5399_s2 + $0x88] sm:$0xff] }
 0x116   :  { %v1011_v15 = vpack.c.bf16 %v3367_v11, %v3367_v11 }
 0x117   :  { %v821_v57 = vpop.f32.mrf.mxu0  ;;  %1547 = vmatpush.bf16.msra.mxu1 %v1522_v52  ;;  %3322 = vmatpush.bf16.msra.mxu2 %v1522_v52  ;;  %v1520_v52 = vpack.c.b16 %v1494_v36, %v1493_v62 }
 0x118   :  { %v822_v10 = vadd.f32 %v821_v57, %v3941_v17  ;;  %1863 = vperm.xlu2 %3335, %v1797_v27   ;;  %v3369_v4 = vpop.eup %3368  ;;  %v1800_v17 = vld [vmem:[%s5404_s7 + $0x58] sm:$0xff]  ;;  %v1492_v27 = vunpack.c.l.b16 %v1012_v55  ;;  %v1803_v55 = vld [vmem:[%s5404_s7 + $0x70] sm:$0xff] }
 0x119   :  { %1858 = vperm.xlu1 %3334, %v1796_v49   ;;  %1853 = vperm.xlu0 %3333, %v1795_v28   ;;  %v935_v49 = vadd.f32 %v934_v31, %v506_v1  ;;  %v1491_v28 = vunpack.c.l.b16 %v1011_v15  ;;  %v1019_v62 = vpack.c.bf16 %v3369_v4, %v3369_v4  ;;  %v936_v31 = vpop.f32.mrf.mxu3  ;;  %v1801_v4 = vld [vmem:[%s5404_s7 + $0x60] sm:$0xff] }
 0x11a   :  { %3370 = vtanh.f32 %v822_v10 }
 0x11b   :  { %1548 = vmatpush.bf16.msra.mxu1 %v1521_v35  ;;  %3323 = vmatpush.bf16.msra.mxu2 %v1521_v35  ;;  %v496_v38 = vpop.permute.xlu0 %495  ;;  %v501_v40 = vpop.permute.xlu1 %500  ;;  %v1519_v10 = vpack.c.b16 %v1492_v27, %v1491_v28  ;;  %3372 = vtanh.f32 %v935_v49  ;;  %v4305_v36 = vunpack.c.l.b16 %v1019_v62  ;;  %v922_v49 = vadd.f32 %v4163_v6, %v4278_v18  ;;  %v1806_v6 = vld [vmem:[%s5404_s7 + $0x88] sm:$0xff]  ;;  %v3242_v18 = vld [vmem:[%s5399_s2 + $0x90] sm:$0xff]  ;;  %v3275_v62 = vld [vmem:[%s5401_s4 + $0x94] sm:$0xf0] }
 0x11c   :  { %v932_v39 = vadd.f32 %v931_v9, %v501_v40  ;;  %v930_v1 = vadd.f32 %v4235_v45, %v496_v38  ;;  %v1802_v38 = vld [vmem:[%s5404_s7 + $0x68] sm:$0xff] }
 0x11e   :  { %3374 = vtanh.f32 %v932_v39 }
 0x11f   :  { %v824_v12 = vpop.f32.mrf.mxu0  ;;  %1549 = vmatpush.bf16.msra.mxu1 %v1520_v52  ;;  %3324 = vmatpush.bf16.msra.mxu2 %v1520_v52  ;;  %3376 = vtanh.f32 %v930_v1 }
 0x120   :  { %v3371_v57 = vpop.eup %3370  ;;  %1878 = vperm.xlu2 %3335, %v1800_v17   ;;  %v825_v11 = vadd.f32 %v824_v12, %v4013_v61  ;;  %v925_v61 = vadd.f32 %v4189_v44, %v4276_v56  ;;  %v927_v44 = vadd.f32 %v4207_v25, %v4272_v0  ;;  %v920_v25 = vadd.f32 %v4137_v43, %v4246_v5 }
 0x121   :  { %1873 = vperm.xlu1 %3334, %v1799_v50   ;;  %1868 = vperm.xlu0 %3333, %v1798_v19   ;;  %v1020_v35 = vpack.c.bf16 %v3371_v57, %v3371_v57  ;;  %v3373_v52 = vpop.eup %3372  ;;  %v915_v43 = vadd.f32 %v4088_v58, %v4254_v7  ;;  %v1804_v58 = vld [vmem:[%s5404_s7 + $0x78] sm:$0xff]  ;;  %v3041_v7 = vld [vmem:[%s5401_s4 + $0x90] sm:$0xf] }
 0x122   :  { %2952 = vmatmul.msk.bf16.gmra.mxu0 %vm673_vm0, %v3241_v8  ;;  %3378 = vtanh.f32 %v825_v11  ;;  %v1065_v0 = vpack.c.bf16 %v3373_v52, %v3373_v52 }
 0x123   :  { %1550 = vmatpush.bf16.msra.mxu1 %v1519_v10  ;;  %3325 = vmatpush.bf16.msra.mxu2 %v1519_v10  ;;  %v511_v40 = vpop.permute.xlu0 %510  ;;  %v4307_v9 = vunpack.c.l.b16 %v1020_v35 }
 0x124   :  { %v937_v45 = vadd.f32 %v936_v31, %v511_v40  ;;  %v3375_v27 = vpop.eup %3374  ;;  %v2203_v12 = vunpack.c.l.b16 %v1065_v0  ;;  %v910_v31 = vadd.f32 %v4035_v16, %v4229_v32  ;;  %v912_v16 = vadd.f32 %v4058_v33, %v4213_v51 }
 0x125   :  { %v1523_v15 = vpack.c.b16 %v4307_v9, %v4305_v36  ;;  %v3377_v50 = vpop.eup %3376  ;;  %v1064_v8 = vpack.c.bf16 %v3375_v27, %v3375_v27  ;;  %v3258_v9 = vld [vmem:[%s5401_s4 + $0x14] sm:$0xf] }
 0x126   :  { %3380 = vtanh.f32 %v937_v45  ;;  %v1063_v28 = vpack.c.bf16 %v3377_v50, %v3377_v50 }
 0x127   :  { %v826_v56 = vpop.f32.mrf.mxu0  ;;  %1551 = vmatpush.bf16.msra.mxu1 %v4123_v37  ;;  %3326 = vmatpush.bf16.msra.mxu2 %v4123_v37  ;;  %3382 = vtanh.f32 %v925_v61  ;;  %v917_v37 = vadd.f32 %v4111_v20, %v4252_v59  ;;  %v2969_v20 = vld [vmem:[%s5401_s4] sm:$0xf]  ;;  %v3257_v59 = vld [vmem:[%s5401_s4 + $0x4] sm:$0xf0]  ;;  %v3042_v61 = vor.u32 %v3275_v62, %v3041_v7  ;;  %v1812_v62 = vld [vmem:[%s5404_s7 + $0xb8] sm:$0xff] }
 0x128   :  { %v827_v17 = vadd.f32 %v826_v56, %v4011_v60  ;;  %1893 = vperm.xlu2 %3335, %v1803_v55   ;;  %v3379_v19 = vpop.eup %3378  ;;  %v2970_v35 = vor.u32 %v3257_v59, %v2969_v20 }
 0x129   :  { %1888 = vperm.xlu1 %3334, %v1802_v38   ;;  %1883 = vperm.xlu0 %3333, %v1801_v4   ;;  %v1021_v57 = vpack.c.bf16 %v3379_v19, %v3379_v19  ;;  %v2202_v4 = vunpack.c.l.b16 %v1064_v8  ;;  %v1808_v19 = vld [vmem:[%s5404_s7 + $0x98] sm:$0xff] }
 0x12a   :  { %3384 = vtanh.f32 %v827_v17 }
 0x12b   :  { %3386 = vtanh.f32 %v927_v44  ;;  %1552 = vmatpush.bf16.msra.mxu1 %v4080_v54  ;;  %3327 = vmatpush.bf16.msra.mxu2 %v4080_v54  ;;  %v1805_v54 = vld [vmem:[%s5404_s7 + $0x80] sm:$0xff]  ;;  %v2201_v44 = vunpack.c.l.b16 %v1063_v28  ;;  %v4369_v32 = vunpack.c.l.b16 %v1021_v57 }
 0x12c   :  { %v3381_v60 = vpop.eup %3380  ;;  %3388 = vtanh.f32 %v922_v49 }
 0x12d   :  { %v1066_v5 = vpack.c.bf16 %v3381_v60, %v3381_v60  ;;  %v3383_v39 = vpop.eup %3382  ;;  %3390 = vtanh.f32 %v920_v25  ;;  %v1807_v25 = vld [vmem:[%s5404_s7 + $0x90] sm:$0xff] }
 0x12e   :  { %3392 = vtanh.f32 %v917_v37  ;;  %v1061_v38 = vpack.c.bf16 %v3383_v39, %v3383_v39 }
 0x12f   :  { %v829_v1 = vpop.f32.mrf.mxu0  ;;  %1553 = vmatpush.bf16.msra.mxu1 %v4040_v21  ;;  %3328 = vmatpush.bf16.msra.mxu2 %v4040_v21  ;;  %v2204_v11 = vunpack.c.l.b16 %v1066_v5  ;;  %3394 = vtanh.f32 %v915_v43 }
 0x130   :  { %v3385_v10 = vpop.eup %3384  ;;  %1908 = vperm.xlu2 %3335, %v1806_v6   ;;  %v830_v21 = vadd.f32 %v829_v1, %v3960_v26  ;;  %3396 = vtanh.f32 %v910_v31  ;;  %v1809_v26 = vld [vmem:[%s5404_s7 + $0xa0] sm:$0xff]  ;;  %v2199_v51 = vunpack.c.l.b16 %v1061_v38  ;;  %v1811_v1 = vld [vmem:[%s5404_s7 + $0xb0] sm:$0xff] }
 0x131   :  { %v3387_v40 = vpop.eup %3386  ;;  %1903 = vperm.xlu1 %3334, %v1805_v54   ;;  %1898 = vperm.xlu0 %3333, %v1804_v58   ;;  %v2220_v45 = vpack.c.b16 %v2204_v11, %v2203_v12  ;;  %v1022_v55 = vpack.c.bf16 %v3385_v10, %v3385_v10  ;;  %v1810_v11 = vld [vmem:[%s5404_s7 + $0xa8] sm:$0xff]  ;;  %v2977_v10 = vld [vmem:[%s5401_s4 + $0x10] sm:$0xf] }
 0x132   :  { %2953 = vmatmul.msk.bf16.gmra.mxu0 %vm673_vm0, %v3242_v18  ;;  %v3389_v56 = vpop.eup %3388  ;;  %v1062_v17 = vpack.c.bf16 %v3387_v40, %v3387_v40  ;;  %3398 = vtanh.f32 %v830_v21  ;;  %v3259_v40 = vld [vmem:[%s5401_s4 + $0x14] sm:$0xf0] }
 0x133   :  { %1554 = vmatpush.bf16.msra.mxu1 %v4003_v53  ;;  %3329 = vmatpush.bf16.msra.mxu2 %v4003_v53  ;;  %v4373_v52 = vunpack.c.l.b16 %v1022_v55  ;;  %v3391_v27 = vpop.eup %3390  ;;  %v1060_v50 = vpack.c.bf16 %v3389_v56, %v3389_v56  ;;  %v2219_v53 = vpack.c.b16 %v2202_v4, %v2201_v44  ;;  %3400 = vtanh.f32 %v912_v16 }
 0x134   :  { %v3393_v33 = vpop.eup %3392  ;;  %v1059_v37 = vpack.c.bf16 %v3391_v27, %v3391_v27  ;;  %v2200_v6 = vunpack.c.l.b16 %v1062_v17  ;;  %v2978_v16 = vor.u32 %v3259_v40, %v2977_v10  ;;  %v2505_v40 = vld [vmem:[%s5407_s10 + $0x8] sm:$0xff] }
 0x135   :  { %v1524_v49 = vpack.c.b16 %v4373_v52, %v4369_v32  ;;  %v3395_v0 = vpop.eup %3394  ;;  %v1058_v43 = vpack.c.bf16 %v3393_v33, %v3393_v33  ;;  %v2198_v20 = vunpack.c.l.b16 %v1060_v50 }
 0x136   :  { %1555 = vmatmul.bf16.vlgmr.msra.gmra.mxu1 %v2970_v35  ;;  %1600 = vmatmul.bf16.vlgmr.msra.gmra.mxu2 %v3042_v61  ;;  %v3397_v54 = vpop.eup %3396  ;;  %v1057_v5 = vpack.c.bf16 %v3395_v0, %v3395_v0  ;;  %v2218_v59 = vpack.c.b16 %v2200_v6, %v2199_v51  ;;  %v2197_v28 = vunpack.c.l.b16 %v1059_v37  ;;  %v3277_v61 = vld [vmem:[%s5401_s4 + $0xa4] sm:$0xf0]  ;;  %v1815_v51 = vld [vmem:[%s5404_s7 + $0xd0] sm:$0xff]  ;;  %v3244_v6 = vld [vmem:[%s5399_s2 + $0xa0] sm:$0xff] }
 0x137   :  { %2326 = vmatpush.bf16.msrb.mxu1 %v2220_v45  ;;  %v831_v60 = vpop.f32.mrf.mxu0  ;;  %v1055_v7 = vpack.c.bf16 %v3397_v54, %v3397_v54  ;;  %v2196_v39 = vunpack.c.l.b16 %v1058_v43  ;;  %v3049_v45 = vld [vmem:[%s5401_s4 + $0xa0] sm:$0xf]  ;;  %v1818_v37 = vld [vmem:[%s5404_s7 + $0xe8] sm:$0xff] }
 0x138   :  { %v832_v18 = vadd.f32 %v831_v60, %v4033_v14  ;;  %1923 = vperm.xlu2 %3335, %v1809_v26   ;;  %v3399_v8 = vpop.eup %3398  ;;  %v3243_v14 = vld [vmem:[%s5399_s2 + $0x98] sm:$0xff]  ;;  %v2195_v12 = vunpack.c.l.b16 %v1057_v5  ;;  %v2217_v57 = vpack.c.b16 %v2198_v20, %v2197_v28  ;;  %v3050_v17 = vor.u32 %v3277_v61, %v3049_v45  ;;  %v2985_v43 = vld [vmem:[%s5401_s4 + $0x20] sm:$0xf]  ;;  %v3261_v20 = vld [vmem:[%s5401_s4 + $0x24] sm:$0xf0] }
 0x139   :  { %1918 = vperm.xlu1 %3334, %v1808_v19   ;;  %1913 = vperm.xlu0 %3333, %v1807_v25   ;;  %v3401_v58 = vpop.eup %3400  ;;  %v1023_v31 = vpack.c.bf16 %v3399_v8, %v3399_v8  ;;  %v2193_v4 = vunpack.c.l.b16 %v1055_v7  ;;  %v1813_v19 = vld [vmem:[%s5404_s7 + $0xc0] sm:$0xff]  ;;  %v3279_v8 = vld [vmem:[%s5401_s4 + $0xb4] sm:$0xf0]  ;;  %v2986_v7 = vor.u32 %v3261_v20, %v2985_v43  ;;  %v2993_v61 = vld [vmem:[%s5401_s4 + $0x30] sm:$0xf] }
 0x13a   :  { %3402 = vtanh.f32 %v832_v18  ;;  %v1056_v38 = vpack.c.bf16 %v3401_v58, %v3401_v58  ;;  %v2216_v56 = vpack.c.b16 %v2196_v39, %v2195_v12  ;;  %v1817_v18 = vld [vmem:[%s5404_s7 + $0xe0] sm:$0xff]  ;;  %v2514_v20 = vld [vmem:[%s5407_s10 + $0x50] sm:$0xff] }
 0x13b   :  { %2327 = vmatpush.bf16.msrb.mxu1 %v2219_v53  ;;  %v4413_v27 = vunpack.c.l.b16 %v1023_v31  ;;  %v1814_v53 = vld [vmem:[%s5404_s7 + $0xc8] sm:$0xff]  ;;  %v2464_v12 = vld [vmem:[%s5406_s9] sm:$0xff]  ;;  %v2506_v31 = vld [vmem:[%s5407_s10 + $0x10] sm:$0xff] }
 0x13c   :  { %v2194_v33 = vunpack.c.l.b16 %v1056_v38  ;;  %v2504_v45 = vld [vmem:[%s5407_s10] sm:$0xff]  ;;  %v3263_v38 = vld [vmem:[%s5401_s4 + $0x34] sm:$0xf0] }
 0x13f   :  { %2328 = vmatpush.bf16.msrb.mxu1 %v2218_v59  ;;  %v834_v35 = vpop.f32.mrf.mxu0  ;;  %v3057_v59 = vld [vmem:[%s5401_s4 + $0xb0] sm:$0xf] }
 0x140   :  { %v3403_v55 = vpop.eup %3402  ;;  %1938 = vperm.xlu2 %3335, %v1812_v62   ;;  %v835_v21 = vadd.f32 %v834_v35, %v4031_v13  ;;  %v2215_v13 = vpack.c.b16 %v2194_v33, %v2193_v4  ;;  %v3058_v62 = vor.u32 %v3279_v8, %v3057_v59  ;;  %v3245_v35 = vld [vmem:[%s5399_s2 + $0xa8] sm:$0xff]  ;;  %v3065_v4 = vld [vmem:[%s5401_s4 + $0xc0] sm:$0xf]  ;;  %v2507_v33 = vld [vmem:[%s5407_s10 + $0x18] sm:$0xff] }
 0x141   :  { %1933 = vperm.xlu1 %3334, %v1811_v1   ;;  %1928 = vperm.xlu0 %3333, %v1810_v11   ;;  %v1024_v44 = vpack.c.bf16 %v3403_v55, %v3403_v55  ;;  %v1820_v1 = vld [vmem:[%s5404_s7 + $0xf8] sm:$0xff]  ;;  %v1819_v11 = vld [vmem:[%s5404_s7 + $0xf0] sm:$0xff]  ;;  %v2513_v59 = vld [vmem:[%s5407_s10 + $0x48] sm:$0xff] }
 0x142   :  { %2954 = vmatmul.msk.bf16.gmra.mxu0 %vm673_vm0, %v3243_v14  ;;  %3404 = vtanh.f32 %v835_v21  ;;  %v2994_v21 = vor.u32 %v3263_v38, %v2993_v61 }
 0x143   :  { %2329 = vmatpush.bf16.msrb.mxu1 %v2217_v57  ;;  %v4415_v26 = vunpack.c.l.b16 %v1024_v44  ;;  %v3281_v44 = vld [vmem:[%s5401_s4 + $0xc4] sm:$0xf0] }
 0x145   :  { %v1525_v50 = vpack.c.b16 %v4415_v26, %v4413_v27  ;;  %v3273_v26 = vld [vmem:[%s5401_s4 + $0x84] sm:$0xf0] }
 0x146   :  { %1560 = vmatmul.bf16.gmra.mxu1 %v2978_v16  ;;  %1605 = vmatmul.bf16.gmra.mxu2 %v3050_v17  ;;  %v2509_v16 = vld [vmem:[%s5407_s10 + $0x28] sm:$0xff]  ;;  %v2508_v17 = vld [vmem:[%s5407_s10 + $0x20] sm:$0xff] }
 0x147   :  { %2330 = vmatpush.bf16.msrb.mxu1 %v2216_v56  ;;  %v836_v25 = vpop.f32.mrf.mxu0  ;;  %v3066_v56 = vor.u32 %v3281_v44, %v3065_v4  ;;  %v2521_v44 = vld [vmem:[%s5407_s10 + $0x88] sm:$0xff] }
 0x148   :  { %v837_v0 = vadd.f32 %v836_v25, %v3975_v34  ;;  %1953 = vperm.xlu2 %3335, %v1815_v51   ;;  %v3405_v60 = vpop.eup %3404  ;;  %v1816_v34 = vld [vmem:[%s5404_s7 + $0xd8] sm:$0xff]  ;;  %v2510_v25 = vld [vmem:[%s5407_s10 + $0x30] sm:$0xff] }
 0x149   :  { %1948 = vperm.xlu1 %3334, %v1814_v53   ;;  %1943 = vperm.xlu0 %3333, %v1813_v19   ;;  %v1025_v54 = vpack.c.bf16 %v3405_v60, %v3405_v60  ;;  %v3246_v53 = vld [vmem:[%s5399_s2 + $0xb0] sm:$0xff]  ;;  %v2511_v19 = vld [vmem:[%s5407_s10 + $0x38] sm:$0xff] }
 0x14a   :  { %3406 = vtanh.f32 %v837_v0  ;;  %v3001_v0 = vld [vmem:[%s5401_s4 + $0x40] sm:$0xf] }
 0x14b   :  { %2331 = vmatpush.bf16.msrb.mxu1 %v2215_v13  ;;  %v4456_v14 = vunpack.c.l.b16 %v1025_v54  ;;  %v2512_v13 = vld [vmem:[%s5407_s10 + $0x40] sm:$0xff]  ;;  %v2515_v54 = vld [vmem:[%s5407_s10 + $0x58] sm:$0xff] }
 0x14f   :  { %v4444_v5 = vpop.f32.mrf.mxu0 }
 0x150   :  { %v3407_v28 = vpop.eup %3406  ;;  %1968 = vperm.xlu2 %3335, %v1818_v37   ;;  %v3265_v37 = vld [vmem:[%s5401_s4 + $0x44] sm:$0xf0] }
 0x151   :  { %1963 = vperm.xlu1 %3334, %v1817_v18   ;;  %1958 = vperm.xlu0 %3333, %v1816_v34   ;;  %v1026_v58 = vpack.c.bf16 %v3407_v28, %v3407_v28  ;;  %v3283_v18 = vld [vmem:[%s5401_s4 + $0xd4] sm:$0xf0]  ;;  %v3002_v34 = vor.u32 %v3265_v37, %v3001_v0  ;;  %v2518_v28 = vld [vmem:[%s5407_s10 + $0x70] sm:$0xff] }
 0x152   :  { %2955 = vmatmul.msk.bf16.gmra.mxu0 %vm673_vm0, %v3244_v6  ;;  %v3073_v6 = vld [vmem:[%s5401_s4 + $0xd0] sm:$0xf] }
 0x153   :  { %v4458_v39 = vunpack.c.l.b16 %v1026_v58  ;;  %v3074_v43 = vor.u32 %v3283_v18, %v3073_v6  ;;  %v3247_v58 = vld [vmem:[%s5399_s2 + $0xb8] sm:$0xff] }
 0x155   :  { %v1526_v57 = vpack.c.b16 %v4458_v39, %v4456_v14  ;;  %v2535_v14 = vld [vmem:[%s5407_s10 + $0xf8] sm:$0xff]  ;;  %v3033_v39 = vld [vmem:[%s5401_s4 + $0x80] sm:$0xf] }
 0x156   :  { %1565 = vmatmul.bf16.gmra.mxu1 %v2986_v7  ;;  %1610 = vmatmul.bf16.gmra.mxu2 %v3058_v62  ;;  %v2517_v7 = vld [vmem:[%s5407_s10 + $0x68] sm:$0xff]  ;;  %v2516_v62 = vld [vmem:[%s5407_s10 + $0x60] sm:$0xff]  ;;  %v3034_v52 = vor.u32 %v3273_v26, %v3033_v39  ;;  %v2995_v26 = vld [vmem:[%s5401_s4 + $0x38] sm:$0xf0] }
 0x157   :  { %v4471_v10 = vpop.f32.mrf.mxu0 }
 0x158   :  { %2467 = vperm.xlu2 %3335, %v2464_v12   ;;  %v3009_v12 = vld [vmem:[%s5401_s4 + $0x50] sm:$0xf] }
 0x159   :  { %1978 = vperm.xlu1 %3334, %v1820_v1   ;;  %1973 = vperm.xlu0 %3333, %v1819_v11   ;;  %v3267_v11 = vld [vmem:[%s5401_s4 + $0x54] sm:$0xf0] }
 0x15f   :  { %v4488_v55 = vpop.f32.mrf.mxu0 }
 0x160   :  { %2548 = vperm.xlu2 %3335, %v2506_v31   ;;  %v3081_v31 = vld [vmem:[%s5401_s4 + $0xe0] sm:$0xf] }
 0x161   :  { %2543 = vperm.xlu1 %3334, %v2505_v40   ;;  %2538 = vperm.xlu0 %3333, %v2504_v45   ;;  %v3010_v45 = vor.u32 %v3267_v11, %v3009_v12  ;;  %v2525_v11 = vld [vmem:[%s5407_s10 + $0xa8] sm:$0xff] }
 0x162   :  { %2956 = vmatmul.msk.bf16.gmra.mxu0 %vm673_vm0, %v3245_v35  ;;  %v3285_v35 = vld [vmem:[%s5401_s4 + $0xe4] sm:$0xf0] }
 0x163   :  { %v3082_v61 = vor.u32 %v3285_v35, %v3081_v31 }
 0x166   :  { %1570 = vmatmul.bf16.gmra.mxu1 %v2994_v21  ;;  %1615 = vmatmul.bf16.gmra.mxu2 %v3066_v56  ;;  %v2520_v21 = vld [vmem:[%s5407_s10 + $0x80] sm:$0xff] }
 0x167   :  { %v846_v51 = vpop.f32.mrf.mxu0 }
 0x168   :  { %2563 = vperm.xlu2 %3335, %v2509_v16   ;;  %v845_v16 = vadd.f32 %v4488_v55, %v3994_v47  ;;  %v2523_v47 = vld [vmem:[%s5407_s10 + $0x98] sm:$0xff] }
 0x169   :  { %2558 = vperm.xlu1 %3334, %v2508_v17   ;;  %2553 = vperm.xlu0 %3333, %v2507_v33   ;;  %v842_v33 = vadd.f32 %v4471_v10, %v4051_v29  ;;  %v2522_v29 = vld [vmem:[%s5407_s10 + $0x90] sm:$0xff]  ;;  %v3017_v10 = vld [vmem:[%s5401_s4 + $0x60] sm:$0xf] }
 0x16f   :  { %v849_v60 = vpop.f32.mrf.mxu0 }
 0x170   :  { %2578 = vperm.xlu2 %3335, %v2512_v13   ;;  %v850_v4 = vadd.f32 %v849_v60, %v4073_v46  ;;  %v840_v13 = vadd.f32 %v4444_v5, %v4053_v30  ;;  %v3269_v30 = vld [vmem:[%s5401_s4 + $0x64] sm:$0xf0]  ;;  %v3089_v5 = vld [vmem:[%s5401_s4 + $0xf0] sm:$0xf] }
 0x171   :  { %2573 = vperm.xlu1 %3334, %v2511_v19   ;;  %2568 = vperm.xlu0 %3333, %v2510_v25   ;;  %v3287_v25 = vld [vmem:[%s5401_s4 + $0xf4] sm:$0xf0] }
 0x172   :  { %2957 = vmatmul.msk.bf16.gmra.mxu0 %vm673_vm0, %v3246_v53 }
 0x176   :  { %1575 = vmatmul.bf16.gmra.mxu1 %v3002_v34  ;;  %1620 = vmatmul.bf16.gmra.mxu2 %v3074_v43  ;;  %v3018_v34 = vor.u32 %v3269_v30, %v3017_v10  ;;  %v3090_v43 = vor.u32 %v3287_v25, %v3089_v5 }
 0x177   :  { %v851_v8 = vpop.f32.mrf.mxu0 }
 0x178   :  { %2593 = vperm.xlu2 %3335, %v2515_v54   ;;  %v852_v38 = vadd.f32 %v851_v8, %v4015_v63  ;;  %v847_v63 = vadd.f32 %v846_v51, %v4075_v48  ;;  %v2524_v48 = vld [vmem:[%s5407_s10 + $0xa0] sm:$0xff]  ;;  %v4614_v54 = vpop.permute.xlu2 %1138 }
 0x179   :  { %2588 = vperm.xlu1 %3334, %v2514_v20   ;;  %2583 = vperm.xlu0 %3333, %v2513_v59  }
 0x17f   :  { %v854_v1 = vpop.f32.mrf.mxu0 }
 0x180   :  { %2608 = vperm.xlu2 %3335, %v2518_v28   ;;  %v855_v40 = vadd.f32 %v854_v1, %v4095_v3  ;;  %v2519_v3 = vld [vmem:[%s5407_s10 + $0x78] sm:$0xff] }
 0x181   :  { %2603 = vperm.xlu1 %3334, %v2517_v7   ;;  %2598 = vperm.xlu0 %3333, %v2516_v62   ;;  %v2527_v62 = vld [vmem:[%s5407_s10 + $0xb8] sm:$0xff] }
 0x182   :  { %2958 = vmatmul.msk.bf16.gmra.mxu0 %vm673_vm0, %v3247_v58  ;;  %3408 = vtanh.f32 %v855_v40 }
 0x183   :  { %3410 = vtanh.f32 %v852_v38 }
 0x184   :  { %3412 = vtanh.f32 %v850_v4 }
 0x186   :  { %1580 = vmatmul.bf16.gmra.mxu1 %v3010_v45  ;;  %1625 = vmatmul.bf16.gmra.mxu2 %v3082_v61 }
 0x187   :  { %v856_v56 = vpop.f32.mrf.mxu0 }
 0x188   :  { %v857_v46 = vadd.f32 %v856_v56, %v4093_v2  ;;  %2623 = vperm.xlu2 %3335, %v2521_v44   ;;  %v3409_v17 = vpop.eup %3408  ;;  %v3248_v2 = vld [vmem:[%s5399_s2 + $0xc0] sm:$0xff] }
 0x189   :  { %2618 = vperm.xlu1 %3334, %v2520_v21   ;;  %2613 = vperm.xlu0 %3333, %v2519_v3   ;;  %v3411_v51 = vpop.eup %3410  ;;  %v1033_v53 = vpack.c.bf16 %v3409_v17, %v3409_v17 }
 0x18a   :  { %3414 = vtanh.f32 %v857_v46  ;;  %v3413_v55 = vpop.eup %3412  ;;  %v1032_v60 = vpack.c.bf16 %v3411_v51, %v3411_v51 }
 0x18b   :  { %3416 = vtanh.f32 %v847_v63  ;;  %v1031_v20 = vpack.c.bf16 %v3413_v55, %v3413_v55  ;;  %v1513_v59 = vunpack.c.l.b16 %v1033_v53  ;;  %v4626_v63 = vpop.permute.xlu2 %1153 }
 0x18c   :  { %3418 = vtanh.f32 %v845_v16  ;;  %v1512_v58 = vunpack.c.l.b16 %v1032_v60  ;;  %v2530_v16 = vld [vmem:[%s5407_s10 + $0xd0] sm:$0xff] }
 0x18d   :  { %3420 = vtanh.f32 %v842_v33  ;;  %v1511_v35 = vunpack.c.l.b16 %v1031_v20  ;;  %v2528_v33 = vld [vmem:[%s5407_s10 + $0xc0] sm:$0xff] }
 0x18e   :  { %3422 = vtanh.f32 %v840_v13  ;;  %v2771_v20 = vld [vmem:[%s5408_s11] sm:$0xff] }
 0x18f   :  { %v859_v19 = vpop.f32.mrf.mxu0  ;;  %v1529_v38 = vpack.c.b16 %v1512_v58, %v1511_v35 }
 0x190   :  { %v3415_v0 = vpop.eup %3414  ;;  %2638 = vperm.xlu2 %3335, %v2524_v48   ;;  %v860_v18 = vadd.f32 %v859_v19, %v4042_v22  ;;  %v2526_v22 = vld [vmem:[%s5407_s10 + $0xb0] sm:$0xff]  ;;  %v3249_v48 = vld [vmem:[%s5399_s2 + $0xc8] sm:$0xff]  ;;  %s3636_s2 = smov [#allocation5]  }
 0x191   :  { %v1034_v37 = vpack.c.bf16 %v3415_v0, %v3415_v0  ;;  %2633 = vperm.xlu1 %3334, %v2523_v47   ;;  %2628 = vperm.xlu0 %3333, %v2522_v29   ;;  %v3417_v6 = vpop.eup %3416  ;;  %v3025_v47 = vld [vmem:[%s5401_s4 + $0x70] sm:$0xf]  ;;  %v3271_v29 = vld [vmem:[%s5401_s4 + $0x74] sm:$0xf0]  ;;  %v2533_v0 = vld [vmem:[%s5407_s10 + $0xe8] sm:$0xff]  ;;  %s2795_s7 = sshll.u32 %s3636_s2, 4  ;;  %s2796_s7 = int_to_ptr.vmem [resolvable:$true] %s2795_s7 }
 0x192   :  { %2959 = vmatmul.msk.bf16.gmra.mxu0 %vm673_vm0, %v3248_v2  ;;  %v3419_v28 = vpop.eup %3418  ;;  %v1030_v12 = vpack.c.bf16 %v3417_v6, %v3417_v6  ;;  %3424 = vtanh.f32 %v860_v18  ;;  %v3026_v30 = vor.u32 %v3271_v29, %v3025_v47 }
 0x193   :  { %v1514_v8 = vunpack.c.l.b16 %v1034_v37  ;;  %v3421_v1 = vpop.eup %3420  ;;  %v1029_v31 = vpack.c.bf16 %v3419_v28, %v3419_v28  ;;  %v2531_v37 = vld [vmem:[%s5407_s10 + $0xd8] sm:$0xff]  ;;  %v4663_v6 = vpop.permute.xlu2 %1168 }
 0x194   :  { %v3423_v45 = vpop.eup %3422  ;;  %v1510_v4 = vunpack.c.l.b16 %v1030_v12  ;;  %v1028_v44 = vpack.c.bf16 %v3421_v1, %v3421_v1 }
 0x195   :  { %v1530_v7 = vpack.c.b16 %v1514_v8, %v1513_v59  ;;  %v1027_v21 = vpack.c.bf16 %v3423_v45, %v3423_v45  ;;  %v1509_v3 = vunpack.c.l.b16 %v1029_v31  ;;  %v2971_v59 = vld [vmem:[%s5401_s4 + $0x8] sm:$0xf0]  ;;  %v5426_v31 = vld [vmem:[#allocation10_spill] sm:$0xff] }
 0x196   :  { %1585 = vmatmul.bf16.gmra.mxu1 %v3018_v34  ;;  %1630 = vmatmul.bf16.gmra.mxu2 %v3090_v43  ;;  %v1508_v17 = vunpack.c.l.b16 %v1028_v44 }
 0x197   :  { %v861_v40 = vpop.f32.mrf.mxu0  ;;  %1636 = vmatpush.bf16.msrb.mxu2 %v1530_v7  ;;  %v1528_v46 = vpack.c.b16 %v1510_v4, %v1509_v3  ;;  %v1507_v2 = vunpack.c.l.b16 %v1027_v21  ;;  %v1134_v7 = vpop.permute.xlu1 %1133  ;;  %v5427_v3 = vld [vmem:[#allocation8_spill] sm:$0xff] }
 0x198   :  { %v862_v61 = vadd.f32 %v861_v40, %v4116_v24  ;;  %2653 = vperm.xlu2 %3335, %v2527_v62   ;;  %v3425_v56 = vpop.eup %3424  ;;  %v2529_v24 = vld [vmem:[%s5407_s10 + $0xc8] sm:$0xff] }
 0x199   :  { %2648 = vperm.xlu1 %3334, %v2526_v22   ;;  %2643 = vperm.xlu0 %3333, %v2525_v11   ;;  %v1035_v51 = vpack.c.bf16 %v3425_v56, %v3425_v56  ;;  %v1527_v53 = vpack.c.b16 %v1508_v17, %v1507_v2  ;;  %v5428_v2 = vld [vmem:[#allocation13_spill] sm:$0xff] }
 0x19a   :  { %3426 = vtanh.f32 %v862_v61 }
 0x19b   :  { %1637 = vmatpush.bf16.msrb.mxu2 %v1529_v38  ;;  %v4648_v5 = vunpack.c.l.b16 %v1035_v51  ;;  %v4696_v28 = vpop.permute.xlu2 %1183 }
 0x19f   :  { %v864_v13 = vpop.f32.mrf.mxu0  ;;  %1638 = vmatpush.bf16.msrb.mxu2 %v1528_v46 }
 0x1a0   :  { %v3427_v10 = vpop.eup %3426  ;;  %2668 = vperm.xlu2 %3335, %v2530_v16   ;;  %v865_v19 = vadd.f32 %v864_v13, %v4114_v23  ;;  %v2532_v23 = vld [vmem:[%s5407_s10 + $0xe0] sm:$0xff] }
 0x1a1   :  { %v1036_v55 = vpack.c.bf16 %v3427_v10, %v3427_v10  ;;  %2663 = vperm.xlu1 %3334, %v2529_v24   ;;  %2658 = vperm.xlu0 %3333, %v2528_v33  }
 0x1a2   :  { %2960 = vmatmul.msk.bf16.gmra.mxu0 %vm673_vm0, %v3249_v48  ;;  %3428 = vtanh.f32 %v865_v19  ;;  %v2987_v19 = vld [vmem:[%s5401_s4 + $0x28] sm:$0xf0] }
 0x1a3   :  { %v4650_v25 = vunpack.c.l.b16 %v1036_v55  ;;  %1639 = vmatpush.bf16.msrb.mxu2 %v1527_v53  ;;  %v4713_v45 = vpop.permute.xlu2 %1198  ;;  %v3260_v53 = vld [vmem:[%s5401_s4 + $0x24] sm:$0xf] }
 0x1a5   :  { %v2205_v60 = vpack.c.b16 %v4650_v25, %v4648_v5 }
 0x1a6   :  { %1590 = vmatmul.bf16.gmra.mxu1 %v3026_v30 }
 0x1a7   :  { %v866_v18 = vpop.f32.mrf.mxu0  ;;  %1640 = vmatpush.bf16.msrb.mxu2 %v1526_v57 }
 0x1a8   :  { %v867_v34 = vadd.f32 %v866_v18, %v4069_v42  ;;  %2683 = vperm.xlu2 %3335, %v2533_v0   ;;  %v3429_v43 = vpop.eup %3428  ;;  %v2534_v42 = vld [vmem:[%s5407_s10 + $0xf0] sm:$0xff] }
 0x1a9   :  { %2678 = vperm.xlu1 %3334, %v2532_v23   ;;  %2673 = vperm.xlu0 %3333, %v2531_v37   ;;  %v1037_v57 = vpack.c.bf16 %v3429_v43, %v3429_v43  ;;  %v2990_v37 = vor.u32 %v3260_v53, %v2987_v19  ;;  %v5436_v19 = vld [vmem:[#allocation14_spill] sm:$0xff] }
 0x1aa   :  { %3430 = vtanh.f32 %v867_v34 }
 0x1ab   :  { %1641 = vmatpush.bf16.msrb.mxu2 %v1525_v50  ;;  %v3256_v50 = vld [vmem:[%s5401_s4 + $0x4] sm:$0xf]  ;;  %v4699_v62 = vunpack.c.l.b16 %v1037_v57  ;;  %v4728_v24 = vpop.permute.xlu2 %1213 }
 0x1af   :  { %v869_v27 = vpop.f32.mrf.mxu0  ;;  %1642 = vmatpush.bf16.msrb.mxu2 %v1524_v49  ;;  %v2974_v49 = vor.u32 %v3256_v50, %v2971_v59 }
 0x1b0   :  { %v3431_v8 = vpop.eup %3430  ;;  %2774 = vperm.xlu2 %3335, %v2771_v20   ;;  %v870_v32 = vadd.f32 %v869_v27, %v4135_v41  ;;  %v3262_v27 = vld [vmem:[%s5401_s4 + $0x34] sm:$0xf] }
 0x1b1   :  { %v1038_v58 = vpack.c.bf16 %v3431_v8, %v3431_v8  ;;  %2693 = vperm.xlu1 %3334, %v2535_v14   ;;  %2688 = vperm.xlu0 %3333, %v2534_v42   ;;  %v2998_v59 = vor.u32 %v3262_v27, %v2995_v26  ;;  %v5439_v27 = vld [vmem:[#allocation9_spill] sm:$0xff] }
 0x1b2   :  { %3432 = vtanh.f32 %v870_v32 }
 0x1b3   :  { %v4701_v12 = vunpack.c.l.b16 %v1038_v58  ;;  %v1556_v1 = vpop.f32.mrf.mxu1  ;;  %1643 = vmatpush.bf16.msrb.mxu2 %v1523_v15  ;;  %v2979_v15 = vld [vmem:[%s5401_s4 + $0x18] sm:$0xf0]  ;;  %v4735_v29 = vpop.permute.xlu2 %1228 }
 0x1b4   :  { %v4706_v22 = vadd.f32 %v1556_v1, %v1134_v7  ;;  %v2982_v46 = vor.u32 %v3258_v9, %v2979_v15  ;;  %v3011_v9 = vld [vmem:[%s5401_s4 + $0x58] sm:$0xf0]  ;;  %v5432_v15 = vld [vmem:[#allocation18_spill] sm:$0xff] }
 0x1b5   :  { %v2206_v11 = vpack.c.b16 %v4701_v12, %v4699_v62 }
 0x1b6   :  { %1595 = vmatmul.bf16.gmra.mxu1 %v3034_v52  ;;  %1644 = vmatmul.bf16.vlgmr.msrb.gmra.mxu2 %v2974_v49  ;;  %v3264_v52 = vld [vmem:[%s5401_s4 + $0x44] sm:$0xf]  ;;  %v3003_v49 = vld [vmem:[%s5401_s4 + $0x48] sm:$0xf0] }
 0x1b7   :  { %v871_v41 = vpop.f32.mrf.mxu0  ;;  %v3006_v7 = vor.u32 %v3264_v52, %v3003_v49  ;;  %v5440_v49 = vld [vmem:[#allocation12_spill] sm:$0xff] }
 0x1b8   :  { %v872_v35 = vadd.f32 %v871_v41, %v5426_v31  ;;  %v3433_v61 = vpop.eup %3432  ;;  %v4771_v31 = vpop.permute.xlu1 %1148 }
 0x1b9   :  { %v4711_v40 = vpop.f32.mrf.mxu2  ;;  %v1039_v38 = vpack.c.bf16 %v3433_v61, %v3433_v61 }
 0x1ba   :  { %3434 = vtanh.f32 %v872_v35  ;;  %v4773_v35 = vpop.permute.xlu0 %1143 }
 0x1bb   :  { %v4724_v16 = vunpack.c.l.b16 %v1039_v38  ;;  %v1244_v14 = vpop.permute.xlu2 %1243 }
 0x1bf   :  { %v874_v36 = vpop.f32.mrf.mxu0 }
 0x1c0   :  { %v3435_v4 = vpop.eup %3434  ;;  %v875_v56 = vadd.f32 %v874_v36, %v5427_v3  ;;  %v3266_v36 = vld [vmem:[%s5401_s4 + $0x54] sm:$0xf]  ;;  %v4784_v3 = vpop.permute.xlu1 %1163 }
 0x1c1   :  { %v1040_v44 = vpack.c.bf16 %v3435_v4, %v3435_v4  ;;  %v4721_v21 = vpop.f32.mrf.mxu2 }
 0x1c2   :  { %3436 = vtanh.f32 %v875_v56  ;;  %v4786_v56 = vpop.permute.xlu0 %1158 }
 0x1c3   :  { %v4726_v17 = vunpack.c.l.b16 %v1040_v44  ;;  %v3014_v44 = vor.u32 %v3266_v36, %v3011_v9 }
 0x1c5   :  { %v2207_v33 = vpack.c.b16 %v4726_v17, %v4724_v16  ;;  %v3035_v16 = vld [vmem:[%s5401_s4 + $0x88] sm:$0xf0]  ;;  %v3097_v17 = vld [vmem:[%s5403_s6] sm:$0xf] }
 0x1c6   :  { %1649 = vmatmul.bf16.gmra.mxu2 %v2982_v46  ;;  %v5433_v46 = vld [vmem:[#allocation19_spill] sm:$0xff] }
 0x1c7   :  { %v876_v48 = vpop.f32.mrf.mxu0 }
 0x1c8   :  { %v877_v51 = vadd.f32 %v876_v48, %v5428_v2  ;;  %v3437_v47 = vpop.eup %3436  ;;  %v5434_v2 = vld [vmem:[#allocation11_spill] sm:$0xff] }
 0x1c9   :  { %v4733_v13 = vpop.f32.mrf.mxu2  ;;  %v1041_v10 = vpack.c.bf16 %v3437_v47, %v3437_v47 }
 0x1ca   :  { %3438 = vtanh.f32 %v877_v51  ;;  %v4798_v52 = vpop.permute.xlu0 %1173 }
 0x1cb   :  { %v4745_v18 = vunpack.c.l.b16 %v1041_v10  ;;  %v5435_v10 = vld [vmem:[#allocation15_spill] sm:$0xff] }
 0x1cf   :  { %v879_v55 = vpop.f32.mrf.mxu0 }
 0x1d0   :  { %v3439_v30 = vpop.eup %3438 }
 0x1d1   :  { %v1042_v0 = vpack.c.bf16 %v3439_v30, %v3439_v30  ;;  %v4743_v23 = vpop.f32.mrf.mxu2 }
 0x1d3   :  { %v4747_v34 = vunpack.c.l.b16 %v1042_v0 }
 0x1d5   :  { %v2208_v43 = vpack.c.b16 %v4747_v34, %v4745_v18  ;;  %v3272_v18 = vld [vmem:[%s5401_s4 + $0x84] sm:$0xf] }
 0x1d6   :  { %1654 = vmatmul.bf16.gmra.mxu2 %v2990_v37  ;;  %v5438_v37 = vld [vmem:[#allocation16_spill] sm:$0xff]  ;;  %v3038_v12 = vor.u32 %v3272_v18, %v3035_v16  ;;  %v3274_v18 = vld [vmem:[%s5401_s4 + $0x94] sm:$0xf] }
 0x1d7   :  { %v881_v20 = vpop.f32.mrf.mxu0 }
 0x1d8   :  { %v882_v26 = vadd.f32 %v881_v20, %v5439_v27  ;;  %v3019_v20 = vld [vmem:[%s5401_s4 + $0x68] sm:$0xf0] }
 0x1d9   :  { %v1611_v42 = vpop.f32.mrf.mxu2 }
 0x1da   :  { %v4751_v39 = vadd.f32 %v1611_v42, %v1244_v14 }
 0x1df   :  { %v884_v57 = vpop.f32.mrf.mxu0 }
 0x1e0   :  { %v885_v14 = vadd.f32 %v884_v57, %v5438_v37  ;;  %v3268_v57 = vld [vmem:[%s5401_s4 + $0x64] sm:$0xf] }
 0x1e1   :  { %v4759_v50 = vpop.f32.mrf.mxu2 }
 0x1e6   :  { %1659 = vmatmul.bf16.gmra.mxu2 %v2998_v59 }
 0x1e7   :  { %v886_v8 = vpop.f32.mrf.mxu0 }
 0x1e8   :  { %v887_v53 = vadd.f32 %v886_v8, %v5435_v10  ;;  %v880_v8 = vadd.f32 %v879_v55, %v5440_v49  ;;  %v3022_v55 = vor.u32 %v3268_v57, %v3019_v20 }
 0x1e9   :  { %v4761_v58 = vpop.f32.mrf.mxu2 }
 0x1ea   :  { %5429 = vst [vmem:[#allocation10_spill] sm:$0xff] %v4761_v58 }
 0x1ef   :  { %v889_v32 = vpop.f32.mrf.mxu0 }
 0x1f0   :  { %v890_v51 = vadd.f32 %v889_v32, %v5434_v2  ;;  %v4796_v32 = vpop.permute.xlu1 %1178 }
 0x1f1   :  { %v4769_v1 = vpop.f32.mrf.mxu2 }
 0x1f2   :  { %5430 = vst [vmem:[#allocation8_spill] sm:$0xff] %v4769_v1 }
 0x1f6   :  { %1664 = vmatmul.bf16.gmra.mxu2 %v3006_v7 }
 0x1f7   :  { %v891_v41 = vpop.f32.mrf.mxu0 }
 0x1f8   :  { %v892_v48 = vadd.f32 %v891_v41, %v5433_v46 }
 0x1f9   :  { %v4775_v61 = vpop.f32.mrf.mxu2 }
 0x1fa   :  { %5431 = vst [vmem:[#allocation13_spill] sm:$0xff] %v4775_v61 }
 0x1ff   :  { %v894_v38 = vpop.f32.mrf.mxu0 }
 0x200   :  { %v895_v4 = vadd.f32 %v894_v38, %v5432_v15 }
 0x201   :  { %v4792_v0 = vpop.f32.mrf.mxu2 }
 0x202   :  { %3440 = vtanh.f32 %v895_v4  ;;  %5437 = vst [vmem:[#allocation18_spill] sm:$0xff] %v4792_v0 }
 0x203   :  { %3442 = vtanh.f32 %v892_v48 }
 0x204   :  { %3444 = vtanh.f32 %v890_v51 }
 0x206   :  { %1669 = vmatmul.bf16.gmra.mxu2 %v3014_v44  ;;  %v4807_v44 = vpop.f32.mrf.mxu1 }
 0x207   :  { %v896_v47 = vpop.f32.mrf.mxu0 }
 0x208   :  { %v897_v30 = vadd.f32 %v896_v47, %v5436_v19  ;;  %v3441_v42 = vpop.eup %3440 }
 0x209   :  { %v3443_v59 = vpop.eup %3442  ;;  %v1049_v41 = vpack.c.bf16 %v3441_v42, %v3441_v42  ;;  %v4809_v51 = vpop.f32.mrf.mxu2 }
 0x20a   :  { %3446 = vtanh.f32 %v897_v30  ;;  %v3445_v7 = vpop.eup %3444  ;;  %v1048_v9 = vpack.c.bf16 %v3443_v59, %v3443_v59  ;;  %5441 = vst [vmem:[#allocation19_spill] sm:$0xff] %v4809_v51  ;;  %v4813_v59 = vpop.permute.xlu0 %1188  ;;  %v3298_v51 = vld [vmem:[%s5403_s6 + $0x54] sm:$0xf] }
 0x20b   :  { %3448 = vtanh.f32 %v887_v53  ;;  %v1047_v46 = vpack.c.bf16 %v3445_v7, %v3445_v7  ;;  %v2187_v48 = vunpack.c.l.b16 %v1049_v41 }
 0x20c   :  { %3450 = vtanh.f32 %v885_v14  ;;  %v2186_v53 = vunpack.c.l.b16 %v1048_v9 }
 0x20d   :  { %3452 = vtanh.f32 %v882_v26  ;;  %v2185_v14 = vunpack.c.l.b16 %v1047_v46  ;;  %v4811_v26 = vpop.permute.xlu1 %1193  ;;  %v3270_v46 = vld [vmem:[%s5401_s4 + $0x74] sm:$0xf] }
 0x20e   :  { %3454 = vtanh.f32 %v880_v8  ;;  %v4815_v20 = vpop.f32.mrf.mxu1 }
 0x20f   :  { %v899_v38 = vpop.f32.mrf.mxu0  ;;  %v2211_v7 = vpack.c.b16 %v2186_v53, %v2185_v14  ;;  %v5443_v53 = vld [vmem:[#allocation17_spill] sm:$0xff] }
 0x210   :  { %v3447_v36 = vpop.eup %3446 }
 0x211   :  { %v1050_v15 = vpack.c.bf16 %v3447_v36, %v3447_v36  ;;  %v3449_v4 = vpop.eup %3448  ;;  %v4817_v9 = vpop.f32.mrf.mxu2 }
 0x212   :  { %v3451_v47 = vpop.eup %3450  ;;  %v1046_v10 = vpack.c.bf16 %v3449_v4, %v3449_v4  ;;  %5442 = vst [vmem:[#allocation11_spill] sm:$0xff] %v4817_v9 }
 0x213   :  { %v2188_v2 = vunpack.c.l.b16 %v1050_v15  ;;  %v3453_v30 = vpop.eup %3452  ;;  %v1045_v37 = vpack.c.bf16 %v3451_v47, %v3451_v47 }
 0x214   :  { %v3455_v27 = vpop.eup %3454  ;;  %v1044_v49 = vpack.c.bf16 %v3453_v30, %v3453_v30  ;;  %v2184_v8 = vunpack.c.l.b16 %v1046_v10  ;;  %v4827_v10 = vpop.permute.xlu0 %1203 }
 0x215   :  { %v2212_v19 = vpack.c.b16 %v2188_v2, %v2187_v48  ;;  %v1043_v41 = vpack.c.bf16 %v3455_v27, %v3455_v27  ;;  %v2183_v57 = vunpack.c.l.b16 %v1045_v37  ;;  %v3027_v48 = vld [vmem:[%s5401_s4 + $0x78] sm:$0xf0]  ;;  %v4825_v47 = vpop.permute.xlu1 %1208  ;;  %v5444_v37 = vld [vmem:[#allocation20_spill] sm:$0xff]  ;;  %v5445_v27 = vld [vmem:[#allocation21_spill] sm:$0xff] }
 0x216   :  { %1674 = vmatmul.bf16.gmra.mxu2 %v3022_v55  ;;  %v2182_v36 = vunpack.c.l.b16 %v1044_v49  ;;  %v3030_v30 = vor.u32 %v3270_v46, %v3027_v48  ;;  %v900_v49 = vadd.f32 %v899_v38, %v5445_v27 }
 0x217   :  { %v901_v42 = vpop.f32.mrf.mxu0  ;;  %2237 = vmatpush.bf16.msrb.mxu3 %v2212_v19  ;;  %v2210_v15 = vpack.c.b16 %v2184_v8, %v2183_v57  ;;  %v2181_v4 = vunpack.c.l.b16 %v1043_v41  ;;  %v4832_v8 = vpop.f32.mrf.mxu1  ;;  %v5447_v57 = vld [vmem:[#allocation22_spill] sm:$0xff] }
 0x218   :  { %v902_v14 = vadd.f32 %v901_v42, %v5444_v37 }
 0x219   :  { %v2209_v2 = vpack.c.b16 %v2182_v36, %v2181_v4 }
 0x21b   :  { %2238 = vmatpush.bf16.msrb.mxu3 %v2211_v7  ;;  %v4834_v7 = vpop.f32.mrf.mxu2 }
 0x21c   :  { %5446 = vst [vmem:[#allocation15_spill] sm:$0xff] %v4834_v7 }
 0x21d   :  { %v4843_v42 = vpop.permute.xlu1 %1223 }
 0x21f   :  { %v904_v55 = vpop.f32.mrf.mxu0  ;;  %2239 = vmatpush.bf16.msrb.mxu3 %v2210_v15  ;;  %v4845_v15 = vpop.permute.xlu0 %1218 }
 0x220   :  { %v905_v19 = vadd.f32 %v904_v55, %v5443_v53  ;;  %v4862_v46 = vpop.f32.mrf.mxu1 }
 0x222   :  { %3456 = vtanh.f32 %v905_v19 }
 0x223   :  { %2240 = vmatpush.bf16.msrb.mxu3 %v2209_v2  ;;  %3458 = vtanh.f32 %v902_v14  ;;  %v4864_v2 = vpop.f32.mrf.mxu2 }
 0x224   :  { %3460 = vtanh.f32 %v900_v49  ;;  %5448 = vst [vmem:[#allocation14_spill] sm:$0xff] %v4864_v2 }
 0x225   :  { %v4869_v27 = vpop.permute.xlu1 %1238 }
 0x226   :  { %1679 = vmatmul.bf16.gmra.mxu2 %v3030_v30 }
 0x227   :  { %v906_v41 = vpop.f32.mrf.mxu0  ;;  %2241 = vmatpush.bf16.msrb.mxu3 %v2208_v43  ;;  %v4871_v49 = vpop.permute.xlu0 %1233 }
 0x228   :  { %v907_v36 = vadd.f32 %v906_v41, %v5447_v57  ;;  %v3457_v38 = vpop.eup %3456  ;;  %v3288_v57 = vld [vmem:[%s5403_s6 + $0x4] sm:$0xf] }
 0x229   :  { %v3459_v4 = vpop.eup %3458  ;;  %v1053_v43 = vpack.c.bf16 %v3457_v38, %v3457_v38 }
 0x22a   :  { %3462 = vtanh.f32 %v907_v36  ;;  %v3461_v34 = vpop.eup %3460  ;;  %v1052_v48 = vpack.c.bf16 %v3459_v4, %v3459_v4  ;;  %v3099_v36 = vld [vmem:[%s5403_s6 + $0x8] sm:$0xf0]  ;;  %v4880_v4 = vpop.f32.mrf.mxu1 }
 0x22b   :  { %2242 = vmatpush.bf16.msrb.mxu3 %v2207_v33  ;;  %v3289_v33 = vld [vmem:[%s5403_s6 + $0x4] sm:$0xf0]  ;;  %v1051_v53 = vpack.c.bf16 %v3461_v34, %v3461_v34  ;;  %v2191_v19 = vunpack.c.l.b16 %v1053_v43  ;;  %v3102_v38 = vor.u32 %v3288_v57, %v3099_v36  ;;  %v3043_v34 = vld [vmem:[%s5401_s4 + $0x98] sm:$0xf0]  ;;  %v3105_v43 = vld [vmem:[%s5403_s6 + $0x10] sm:$0xf] }
 0x22c   :  { %v2190_v37 = vunpack.c.l.b16 %v1052_v48 }
 0x22d   :  { %v2189_v41 = vunpack.c.l.b16 %v1051_v53  ;;  %v4894_v16 = vpop.permute.xlu1 %1253  ;;  %v3290_v53 = vld [vmem:[%s5403_s6 + $0x14] sm:$0xf] }
 0x22f   :  { %2243 = vmatpush.bf16.msrb.mxu3 %v2206_v11  ;;  %v3098_v11 = vor.u32 %v3289_v33, %v3097_v17  ;;  %v2213_v25 = vpack.c.b16 %v2190_v37, %v2189_v41  ;;  %v4896_v17 = vpop.permute.xlu0 %1248  ;;  %v1559_v33 = vadd.f32 %v4807_v44, %v4614_v54  ;;  %v1562_v54 = vadd.f32 %v4815_v20, %v4773_v35  ;;  %v3051_v20 = vld [vmem:[%s5401_s4 + $0xa8] sm:$0xf0] }
 0x230   :  { %v3463_v55 = vpop.eup %3462 }
 0x231   :  { %v1054_v62 = vpack.c.bf16 %v3463_v55, %v3463_v55 }
 0x233   :  { %v2192_v30 = vunpack.c.l.b16 %v1054_v62  ;;  %2244 = vmatpush.bf16.msrb.mxu3 %v2205_v60  ;;  %v3046_v62 = vor.u32 %v3274_v18, %v3043_v34  ;;  %v3293_v18 = vld [vmem:[%s5403_s6 + $0x24] sm:$0xf0]  ;;  %v1564_v34 = vadd.f32 %v4832_v8, %v4771_v31  ;;  %v3115_v31 = vld [vmem:[%s5403_s6 + $0x28] sm:$0xf0]  ;;  %v1567_v8 = vadd.f32 %v4862_v46, %v4626_v63  ;;  %v3278_v63 = vld [vmem:[%s5401_s4 + $0xb4] sm:$0xf] }
 0x234   :  { %v3059_v46 = vld [vmem:[%s5401_s4 + $0xb8] sm:$0xf0] }
 0x235   :  { %v2214_v14 = vpack.c.b16 %v2192_v30, %v2191_v19  ;;  %v3107_v19 = vld [vmem:[%s5403_s6 + $0x18] sm:$0xf0]  ;;  %v4908_v30 = vpop.permute.xlu2 %1258  ;;  %v4916_v41 = vpop.permute.xlu1 %1268 }
 0x236   :  { %1684 = vmatmul.bf16.gmra.mxu2 %v3038_v12  ;;  %2245 = vmatmul.bf16.vlgmr.msrb.gmra.mxu3 %v3098_v11  ;;  %v4900_v11 = vpop.f32.mrf.mxu1  ;;  %5449 = vst [vmem:[#allocation16_spill] sm:$0xff] %v4908_v30 }
 0x237   :  { %2332 = vmatpush.bf16.msrb.mxu1 %v2214_v14  ;;  %5450 = vst [vmem:[#allocation9_spill] sm:$0xff] %v4916_v41  ;;  %v4918_v57 = vpop.permute.xlu0 %1263 }
 0x238   :  { %5451 = vst [vmem:[#allocation12_spill] sm:$0xff] %v4918_v57  ;;  %v3296_v57 = vld [vmem:[%s5403_s6 + $0x44] sm:$0xf] }
 0x239   :  { %v1645_v5 = vpop.f32.mrf.mxu2 }
 0x23a   :  { %v1646_v60 = vadd.f32 %v1645_v5, %v4706_v22  ;;  %v3291_v22 = vld [vmem:[%s5403_s6 + $0x14] sm:$0xf0]  ;;  %v3110_v5 = vor.u32 %v3290_v53, %v3107_v19  ;;  %v3292_v53 = vld [vmem:[%s5403_s6 + $0x24] sm:$0xf] }
 0x23b   :  { %2333 = vmatpush.bf16.msrb.mxu1 %v2213_v25  ;;  %v3106_v12 = vor.u32 %v3291_v22, %v3105_v43  ;;  %v3294_v25 = vld [vmem:[%s5403_s6 + $0x34] sm:$0xf] }
 0x23c   :  { %3464 = vtanh.f32 %v1646_v60  ;;  %v3276_v60 = vld [vmem:[%s5401_s4 + $0xa4] sm:$0xf] }
 0x23d   :  { %v4938_v22 = vpop.permute.xlu2 %1273 }
 0x23e   :  { %2334 = vmatmul.bf16.vlgmr.msrb.gmra.mxu1 %v3102_v38  ;;  %v4925_v35 = vpop.f32.mrf.mxu1  ;;  %v3113_v38 = vld [vmem:[%s5403_s6 + $0x20] sm:$0xf]  ;;  %5452 = vst [vmem:[#allocation17_spill] sm:$0xff] %v4938_v22  ;;  %v3139_v22 = vld [vmem:[%s5403_s6 + $0x58] sm:$0xf0] }
 0x241   :  { %v1647_v55 = vpop.f32.mrf.mxu2 }
 0x242   :  { %v1648_v48 = vadd.f32 %v1647_v55, %v1559_v33  ;;  %v4912_v44 = vpop.eup %3464  ;;  %v3054_v55 = vor.u32 %v3276_v60, %v3051_v20  ;;  %v3118_v60 = vor.u32 %v3292_v53, %v3115_v31  ;;  %v3062_v31 = vor.u32 %v3278_v63, %v3059_v46 }
 0x244   :  { %3466 = vtanh.f32 %v1648_v48  ;;  %v3114_v48 = vor.u32 %v3293_v18, %v3113_v38 }
 0x245   :  { %v4958_v38 = vpop.permute.xlu2 %1288 }
 0x246   :  { %1689 = vmatmul.bf16.gmra.mxu2 %v3046_v62  ;;  %2250 = vmatmul.bf16.gmra.mxu3 %v3106_v12  ;;  %v4940_v62 = vpop.permute.xlu1 %1283  ;;  %v4942_v12 = vpop.permute.xlu0 %1278  ;;  %5455 = vst [vmem:[#allocation22_spill] sm:$0xff] %v4958_v38 }
 0x247   :  { %5453 = vst [vmem:[#allocation20_spill] sm:$0xff] %v4940_v62  ;;  %v3300_v62 = vld [vmem:[%s5403_s6 + $0x64] sm:$0xf] }
 0x248   :  { %5454 = vst [vmem:[#allocation21_spill] sm:$0xff] %v4942_v12 }
 0x249   :  { %v1650_v37 = vpop.f32.mrf.mxu2 }
 0x24a   :  { %v4914_v14 = vpop.eup %3466  ;;  %v1651_v36 = vadd.f32 %v1650_v37, %v1562_v54  ;;  %v1576_v54 = vpop.f32.mrf.mxu1 }
 0x24c   :  { %3468 = vtanh.f32 %v1651_v36 }
 0x24e   :  { %2339 = vmatmul.bf16.gmra.mxu1 %v3110_v5  ;;  %v4960_v18 = vpop.permute.xlu1 %1828 }
 0x251   :  { %v1652_v43 = vpop.f32.mrf.mxu2 }
 0x252   :  { %v1653_v33 = vadd.f32 %v1652_v43, %v1564_v34  ;;  %v4952_v19 = vpop.eup %3468  ;;  %v4962_v34 = vpop.permute.xlu0 %1823  ;;  %v3121_v43 = vld [vmem:[%s5403_s6 + $0x30] sm:$0xf] }
 0x254   :  { %3470 = vtanh.f32 %v1653_v33  ;;  %v3295_v33 = vld [vmem:[%s5403_s6 + $0x34] sm:$0xf0] }
 0x256   :  { %1694 = vmatmul.bf16.gmra.mxu2 %v3054_v55  ;;  %2255 = vmatmul.bf16.gmra.mxu3 %v3114_v48  ;;  %v1569_v55 = vadd.f32 %v4880_v4, %v4786_v56  ;;  %v3123_v56 = vld [vmem:[%s5403_s6 + $0x38] sm:$0xf0]  ;;  %v4988_v4 = vpop.permute.xlu1 %1843 }
 0x259   :  { %v1655_v37 = vpop.f32.mrf.mxu2 }
 0x25a   :  { %v4954_v36 = vpop.eup %3470  ;;  %v1656_v5 = vadd.f32 %v1655_v37, %v1567_v8  ;;  %v3122_v8 = vor.u32 %v3295_v33, %v3121_v43  ;;  %v4978_v37 = vpop.f32.mrf.mxu1 }
 0x25b   :  { %v4990_v63 = vpop.permute.xlu0 %1838 }
 0x25c   :  { %3472 = vtanh.f32 %v1656_v5  ;;  %v1572_v5 = vadd.f32 %v4900_v11, %v4784_v3  ;;  %v3067_v3 = vld [vmem:[%s5401_s4 + $0xc8] sm:$0xf0]  ;;  %v3129_v11 = vld [vmem:[%s5403_s6 + $0x40] sm:$0xf] }
 0x25e   :  { %2344 = vmatmul.bf16.gmra.mxu1 %v3118_v60  ;;  %v4980_v60 = vpop.permute.xlu2 %1833 }
 0x261   :  { %v1657_v48 = vpop.f32.mrf.mxu2 }
 0x262   :  { %v1658_v53 = vadd.f32 %v1657_v48, %v1569_v55  ;;  %v4994_v46 = vpop.eup %3472  ;;  %v3126_v48 = vor.u32 %v3294_v25, %v3123_v56  ;;  %v3297_v25 = vld [vmem:[%s5403_s6 + $0x44] sm:$0xf0] }
 0x263   :  { %v5020_v20 = vpop.permute.xlu0 %1853  ;;  %v3130_v30 = vor.u32 %v3297_v25, %v3129_v11 }
 0x264   :  { %3474 = vtanh.f32 %v1658_v53 }
 0x266   :  { %1699 = vmatmul.bf16.gmra.mxu2 %v3062_v31  ;;  %2260 = vmatmul.bf16.gmra.mxu3 %v3122_v8  ;;  %v5000_v31 = vpop.f32.mrf.mxu1  ;;  %v3280_v8 = vld [vmem:[%s5401_s4 + $0xc4] sm:$0xf]  ;;  %v5014_v56 = vpop.permute.xlu2 %1848 }
 0x267   :  { %v3070_v1 = vor.u32 %v3280_v8, %v3067_v3 }
 0x269   :  { %v1660_v43 = vpop.f32.mrf.mxu2 }
 0x26a   :  { %v4996_v33 = vpop.eup %3474  ;;  %v1661_v55 = vadd.f32 %v1660_v43, %v1572_v5  ;;  %v1574_v5 = vadd.f32 %v4925_v35, %v4663_v6  ;;  %v3131_v6 = vld [vmem:[%s5403_s6 + $0x48] sm:$0xf0]  ;;  %v1577_v35 = vadd.f32 %v1576_v54, %v4798_v52  ;;  %v3282_v52 = vld [vmem:[%s5401_s4 + $0xd4] sm:$0xf]  ;;  %v3075_v54 = vld [vmem:[%s5401_s4 + $0xd8] sm:$0xf0] }
 0x26b   :  { %v5043_v25 = vpop.permute.xlu0 %1868 }
 0x26c   :  { %3476 = vtanh.f32 %v1661_v55  ;;  %5458 = vst [vmem:[#allocation25_spill] sm:$0xff] %v5043_v25 }
 0x26e   :  { %2349 = vmatmul.bf16.gmra.mxu1 %v3126_v48  ;;  %v5018_v48 = vpop.permute.xlu1 %1858  ;;  %v5022_v61 = vpop.f32.mrf.mxu1 }
 0x26f   :  { %v5035_v55 = vpop.permute.xlu2 %1863 }
 0x270   :  { %5456 = vst [vmem:[#allocation23_spill] sm:$0xff] %v5035_v55 }
 0x271   :  { %v1662_v43 = vpop.f32.mrf.mxu2 }
 0x272   :  { %v1663_v53 = vadd.f32 %v1662_v43, %v1574_v5  ;;  %v5031_v0 = vpop.eup %3476  ;;  %v3299_v5 = vld [vmem:[%s5403_s6 + $0x54] sm:$0xf0] }
 0x273   :  { %v5065_v41 = vpop.permute.xlu0 %1883 }
 0x274   :  { %3478 = vtanh.f32 %v1663_v53  ;;  %5461 = vst [vmem:[#allocation28_spill] sm:$0xff] %v5065_v41 }
 0x276   :  { %1704 = vmatmul.bf16.gmra.mxu2 %v3070_v1  ;;  %2265 = vmatmul.bf16.gmra.mxu3 %v3130_v30  ;;  %v3134_v30 = vor.u32 %v3296_v57, %v3131_v6  ;;  %v5041_v11 = vpop.permute.xlu1 %1873  ;;  %v3137_v57 = vld [vmem:[%s5403_s6 + $0x50] sm:$0xf]  ;;  %v5057_v43 = vpop.f32.mrf.mxu1 }
 0x277   :  { %5457 = vst [vmem:[#allocation24_spill] sm:$0xff] %v5041_v11  ;;  %v3155_v11 = vld [vmem:[%s5403_s6 + $0x78] sm:$0xf0] }
 0x279   :  { %v1665_v8 = vpop.f32.mrf.mxu2 }
 0x27a   :  { %v5033_v3 = vpop.eup %3478  ;;  %v5037_v1 = vadd.f32 %v1665_v8, %v1577_v35  ;;  %v3078_v35 = vor.u32 %v3282_v52, %v3075_v54  ;;  %v3138_v8 = vor.u32 %v3299_v5, %v3137_v57  ;;  %v3142_v52 = vor.u32 %v3298_v51, %v3139_v22  ;;  %v3284_v5 = vld [vmem:[%s5401_s4 + $0xe4] sm:$0xf]  ;;  %v3301_v51 = vld [vmem:[%s5403_s6 + $0x64] sm:$0xf0] }
 0x27b   :  { %v5091_v38 = vpop.permute.xlu0 %1898 }
 0x27c   :  { %5464 = vst [vmem:[#allocation31_spill] sm:$0xff] %v5091_v38 }
 0x27e   :  { %2354 = vmatmul.bf16.gmra.mxu1 %v3134_v30  ;;  %v5061_v30 = vpop.permute.xlu2 %1878  ;;  %v5063_v53 = vpop.permute.xlu1 %1888 }
 0x27f   :  { %5459 = vst [vmem:[#allocation26_spill] sm:$0xff] %v5061_v30  ;;  %v1588_v54 = vpop.f32.mrf.mxu1  ;;  %v3302_v30 = vld [vmem:[%s5403_s6 + $0x74] sm:$0xf] }
 0x280   :  { %5460 = vst [vmem:[#allocation27_spill] sm:$0xff] %v5063_v53  ;;  %v3158_v58 = vor.u32 %v3302_v30, %v3155_v11  ;;  %v1589_v11 = vadd.f32 %v1588_v54, %v4713_v45  ;;  %v1582_v45 = vadd.f32 %v5000_v31, %v4696_v28 }
 0x281   :  { %v5059_v6 = vpop.f32.mrf.mxu2 }
 0x283   :  { %v5103_v38 = vpop.permute.xlu0 %1913 }
 0x284   :  { %5467 = vst [vmem:[#allocation34_spill] sm:$0xff] %v5103_v38 }
 0x286   :  { %1709 = vmatmul.bf16.gmra.mxu2 %v3078_v35  ;;  %2270 = vmatmul.bf16.gmra.mxu3 %v3138_v8  ;;  %v5075_v57 = vpop.permute.xlu2 %1893  ;;  %v3083_v35 = vld [vmem:[%s5401_s4 + $0xe8] sm:$0xf0]  ;;  %v3145_v8 = vld [vmem:[%s5403_s6 + $0x60] sm:$0xf]  ;;  %v5089_v22 = vpop.permute.xlu1 %1903 }
 0x287   :  { %5462 = vst [vmem:[#allocation29_spill] sm:$0xff] %v5075_v57  ;;  %v3086_v9 = vor.u32 %v3284_v5, %v3083_v35  ;;  %v3146_v12 = vor.u32 %v3301_v51, %v3145_v8  ;;  %v1591_v7 = vpop.f32.mrf.mxu1  ;;  %v3147_v57 = vld [vmem:[%s5403_s6 + $0x68] sm:$0xf0]  ;;  %v3091_v35 = vld [vmem:[%s5401_s4 + $0xf8] sm:$0xf0] }
 0x288   :  { %5463 = vst [vmem:[#allocation30_spill] sm:$0xff] %v5089_v22  ;;  %v3150_v5 = vor.u32 %v3300_v62, %v3147_v57  ;;  %v3153_v8 = vld [vmem:[%s5403_s6 + $0x70] sm:$0xf]  ;;  %v3303_v51 = vld [vmem:[%s5403_s6 + $0x74] sm:$0xf0] }
 0x289   :  { %v5073_v2 = vpop.f32.mrf.mxu2 }
 0x28a   :  { %v1671_v31 = vadd.f32 %v5073_v2, %v1582_v45 }
 0x28e   :  { %2359 = vmatmul.bf16.gmra.mxu1 %v3142_v52  ;;  %v5099_v53 = vpop.permute.xlu2 %1908  ;;  %v5101_v22 = vpop.permute.xlu1 %1918 }
 0x28f   :  { %5465 = vst [vmem:[#allocation32_spill] sm:$0xff] %v5099_v53  ;;  %v5121_v53 = vpop.permute.xlu0 %1928 }
 0x290   :  { %5466 = vst [vmem:[#allocation33_spill] sm:$0xff] %v5101_v22 }
 0x291   :  { %v1672_v52 = vpop.f32.mrf.mxu2 }
 0x296   :  { %1714 = vmatmul.bf16.gmra.mxu2 %v3086_v9  ;;  %2275 = vmatmul.bf16.gmra.mxu3 %v3146_v12  ;;  %v3286_v9 = vld [vmem:[%s5401_s4 + $0xf4] sm:$0xf]  ;;  %v1593_v12 = vpop.f32.mrf.mxu1  ;;  %v5117_v62 = vpop.permute.xlu2 %1923 }
 0x297   :  { %5468 = vst [vmem:[#allocation35_spill] sm:$0xff] %v5117_v62  ;;  %v3094_v57 = vor.u32 %v3286_v9, %v3091_v35  ;;  %v5119_v38 = vpop.permute.xlu1 %1933  ;;  %v1592_v9 = vadd.f32 %v1591_v7, %v4827_v10  ;;  %v1594_v30 = vadd.f32 %v1593_v12, %v4825_v47  ;;  %v1587_v10 = vadd.f32 %v5057_v43, %v4811_v26  ;;  %v3304_v43 = vld [vmem:[%s5403_s6 + $0x84] sm:$0xf] }
 0x298   :  { %5469 = vst [vmem:[#allocation36_spill] sm:$0xff] %v5119_v38  ;;  %v1579_v26 = vadd.f32 %v4978_v37, %v4796_v32 }
 0x299   :  { %v1675_v41 = vpop.f32.mrf.mxu2 }
 0x29a   :  { %v1668_v32 = vadd.f32 %v5059_v6, %v1579_v26  ;;  %v3307_v6 = vld [vmem:[%s5403_s6 + $0x94] sm:$0xf0] }
 0x29e   :  { %2364 = vmatmul.bf16.gmra.mxu1 %v3150_v5  ;;  %v3154_v5 = vor.u32 %v3303_v51, %v3153_v8  ;;  %v1596_v25 = vpop.f32.mrf.mxu1  ;;  %v5129_v62 = vpop.permute.xlu2 %1938 }
 0x29f   :  { %5470 = vst [vmem:[#allocation37_spill] sm:$0xff] %v5129_v62  ;;  %v5132_v35 = vpop.permute.xlu1 %1948  ;;  %v5134_v8 = vpop.permute.xlu0 %1943  ;;  %v1597_v28 = vadd.f32 %v1596_v25, %v4728_v24  ;;  %v3169_v25 = vld [vmem:[%s5403_s6 + $0x90] sm:$0xf] }
 0x2a0   :  { %5471 = vst [vmem:[#allocation38_spill] sm:$0xff] %v5132_v35 }
 0x2a1   :  { %v1677_v22 = vpop.f32.mrf.mxu2  ;;  %5472 = vst [vmem:[#allocation39_spill] sm:$0xff] %v5134_v8  ;;  %v1676_v8 = vadd.f32 %v1675_v41, %v1587_v10 }
 0x2a2   :  { %v1678_v7 = vadd.f32 %v1677_v22, %v1589_v11 }
 0x2a6   :  { %1719 = vmatmul.bf16.gmra.mxu2 %v3094_v57  ;;  %2280 = vmatmul.bf16.gmra.mxu3 %v3154_v5  ;;  %v3161_v57 = vld [vmem:[%s5403_s6 + $0x80] sm:$0xf]  ;;  %v3305_v5 = vld [vmem:[%s5403_s6 + $0x84] sm:$0xf0]  ;;  %v5148_v38 = vpop.permute.xlu2 %1953 }
 0x2a7   :  { %v5162_v41 = vpop.permute.xlu0 %1958 }
 0x2a9   :  { %v1680_v55 = vpop.f32.mrf.mxu2 }
 0x2aa   :  { %v1681_v51 = vadd.f32 %v1680_v55, %v1592_v9  ;;  %v1598_v55 = vpop.f32.mrf.mxu1  ;;  %v1584_v9 = vadd.f32 %v5022_v61, %v4813_v59  ;;  %v3163_v61 = vld [vmem:[%s5403_s6 + $0x88] sm:$0xf0]  ;;  %v5160_v59 = vpop.permute.xlu1 %1963 }
 0x2ac   :  { %3480 = vtanh.f32 %v1681_v51  ;;  %v1673_v47 = vadd.f32 %v1672_v52, %v1584_v9 }
 0x2ae   :  { %2369 = vmatmul.bf16.gmra.mxu1 %v3158_v58  ;;  %v3162_v58 = vor.u32 %v3305_v5, %v3161_v57 }
 0x2af   :  { %v5180_v45 = vpop.permute.xlu0 %1973 }
 0x2b1   :  { %v1682_v62 = vpop.f32.mrf.mxu2 }
 0x2b2   :  { %v1683_v35 = vadd.f32 %v1682_v62, %v1594_v30  ;;  %v3481_v54 = vpop.eup %3480  ;;  %v1599_v30 = vadd.f32 %v1598_v55, %v4845_v15  ;;  %v5178_v9 = vpop.permute.xlu1 %1978 }
 0x2b4   :  { %3482 = vtanh.f32 %v1683_v35  ;;  %v3166_v35 = vor.u32 %v3304_v43, %v3163_v61  ;;  %v3170_v43 = vor.u32 %v3307_v6, %v3169_v25 }
 0x2b5   :  { %3484 = vtanh.f32 %v1678_v7 }
 0x2b6   :  { %2285 = vmatmul.bf16.gmra.mxu3 %v3162_v58  ;;  %3486 = vtanh.f32 %v1676_v8  ;;  %v5174_v8 = vpop.permute.xlu2 %1968 }
 0x2b7   :  { %3488 = vtanh.f32 %v1673_v47  ;;  %v2539_v6 = vpop.permute.xlu0 %2538 }
 0x2b8   :  { %3490 = vtanh.f32 %v1671_v31 }
 0x2b9   :  { %v1685_v37 = vpop.f32.mrf.mxu2  ;;  %v2246_v22 = vpop.f32.mrf.mxu3  ;;  %3492 = vtanh.f32 %v1668_v32 }
 0x2ba   :  { %v3483_v52 = vpop.eup %3482  ;;  %v1686_v12 = vadd.f32 %v1685_v37, %v1597_v28  ;;  %v2247_v62 = vadd.f32 %v2246_v22, %v4962_v34  ;;  %3494 = vtanh.f32 %v5037_v1  ;;  %v1602_v37 = vadd.f32 %v4711_v40, %v4843_v42  ;;  %v2544_v25 = vpop.permute.xlu1 %2543 }
 0x2bb   :  { %v2335_v51 = vpop.f32.mrf.mxu1  ;;  %v2455_v57 = vpack.c.bf16 %v3483_v52, %v3481_v54  ;;  %v3485_v5 = vpop.eup %3484  ;;  %v3306_v54 = vld [vmem:[%s5403_s6 + $0x94] sm:$0xf] }
 0x2bc   :  { %v2336_v11 = vadd.f32 %v2335_v51, %v2247_v62  ;;  %v3487_v24 = vpop.eup %3486  ;;  %3496 = vtanh.f32 %v1686_v12 }
 0x2bd   :  { %2477 = vmatpush.bf16.msra.mxu2 %v2455_v57  ;;  %v2454_v2 = vpack.c.bf16 %v3485_v5, %v3487_v24  ;;  %v3489_v34 = vpop.eup %3488 }
 0x2be   :  { %2374 = vmatmul.bf16.gmra.mxu1 %v3166_v35  ;;  %v3491_v58 = vpop.eup %3490  ;;  %3498 = vtanh.f32 %v2336_v11  ;;  %v5195_v35 = vpop.permute.xlu2 %2467 }
 0x2bf   :  { %v2453_v28 = vpack.c.bf16 %v3489_v34, %v3491_v58  ;;  %v3493_v31 = vpop.eup %3492  ;;  %v1604_v58 = vadd.f32 %v4721_v21, %v4735_v29 }
 0x2c0   :  { %v3495_v1 = vpop.eup %3494 }
 0x2c1   :  { %v1687_v10 = vpop.f32.mrf.mxu2  ;;  %v2248_v7 = vpop.f32.mrf.mxu3  ;;  %2478 = vmatpush.bf16.msra.mxu2 %v2454_v2  ;;  %v2452_v55 = vpack.c.bf16 %v3493_v31, %v3495_v1 }
 0x2c2   :  { %v1688_v47 = vadd.f32 %v1687_v10, %v1599_v30  ;;  %v2249_v26 = vadd.f32 %v2248_v7, %v4960_v18  ;;  %v3171_v18 = vld [vmem:[%s5403_s6 + $0x98] sm:$0xf0]  ;;  %v5189_v32 = vpop.eup %3496  ;;  %v5473_v30 = vpack.c.bf16 %v5033_v3, %v5031_v0  ;;  %v3309_v7 = vld [vmem:[%s5403_s6 + $0xa4] sm:$0xf0]  ;;  %v5474_v0 = vpack.c.bf16 %v4996_v33, %v4994_v46  ;;  %v5217_v3 = vld [vmem:[%s5405_s8] sm:$0xff] }
 0x2c3   :  { %v2337_v61 = vpop.f32.mrf.mxu1  ;;  %v3174_v5 = vor.u32 %v3306_v54, %v3171_v18  ;;  %v2471_v29 = vunpack.c.l.b16 %v5217_v3  ;;  %v5475_v46 = vpack.c.bf16 %v4954_v36, %v4952_v19  ;;  %v3179_v54 = vld [vmem:[%s5403_s6 + $0xa8] sm:$0xf0]  ;;  %v1607_v18 = vadd.f32 %v4733_v13, %v4871_v49  ;;  %v2554_v49 = vpop.permute.xlu0 %2553 }
 0x2c4   :  { %3500 = vtanh.f32 %v1688_v47  ;;  %v2338_v15 = vadd.f32 %v2337_v61, %v2249_v26  ;;  %v3499_v22 = vpop.eup %3498  ;;  %v5476_v36 = vpack.c.bf16 %v4914_v14, %v4912_v44  ;;  %v3185_v44 = vld [vmem:[%s5403_s6 + $0xb0] sm:$0xf]  ;;  %v3311_v14 = vld [vmem:[%s5403_s6 + $0xb4] sm:$0xf0] }
 0x2c5   :  { %2479 = vmatpush.bf16.msra.mxu2 %v2453_v28  ;;  %v2696_v42 = vmul.f32 %v3499_v22, %v2539_v6 }
 0x2c6   :  { %3502 = vtanh.f32 %v2338_v15  ;;  %2290 = vmatmul.bf16.gmra.mxu3 %v3170_v43  ;;  %v2549_v1 = vpop.permute.xlu2 %2548 }
 0x2c9   :  { %v1690_v52 = vpop.f32.mrf.mxu2  ;;  %v2251_v12 = vpop.f32.mrf.mxu3  ;;  %2480 = vmatpush.bf16.msra.mxu2 %v2452_v55 }
 0x2ca   :  { %v5193_v62 = vpop.eup %3500  ;;  %v1691_v51 = vadd.f32 %v1690_v52, %v1602_v37  ;;  %v2252_v57 = vadd.f32 %v2251_v12, %v4980_v60  ;;  %v3177_v60 = vld [vmem:[%s5403_s6 + $0xa0] sm:$0xf]  ;;  %v2473_v37 = vpack.c.b16 %v2471_v29, %v2471_v29 }
 0x2cb   :  { %v2340_v11 = vpop.f32.mrf.mxu1  ;;  %v2456_v24 = vpack.c.bf16 %v5193_v62, %v5189_v32  ;;  %v3178_v28 = vor.u32 %v3309_v7, %v3177_v60  ;;  %v3186_v60 = vor.u32 %v3311_v14, %v3185_v44 }
 0x2cc   :  { %v3503_v2 = vpop.eup %3502  ;;  %v2341_v40 = vadd.f32 %v2340_v11, %v2252_v57 }
 0x2cd   :  { %v2697_v34 = vmul.f32 %v3503_v2, %v2544_v25  ;;  %2481 = vmatpush.bf16.msra.mxu2 %v5473_v30 }
 0x2ce   :  { %3504 = vtanh.f32 %v2341_v40  ;;  %2379 = vmatmul.bf16.gmra.mxu1 %v3174_v5 }
 0x2cf   :  { %v2728_v10 = vadd.f32 %v2697_v34, %v2696_v42  ;;  %3506 = vtanh.f32 %v1691_v51 }
 0x2d1   :  { %v1692_v47 = vpop.f32.mrf.mxu2  ;;  %v2253_v26 = vpop.f32.mrf.mxu3  ;;  %2482 = vmatpush.bf16.msra.mxu2 %v5474_v0 }
 0x2d2   :  { %v1693_v43 = vadd.f32 %v1692_v47, %v1604_v58  ;;  %v2254_v61 = vadd.f32 %v2253_v26, %v4990_v63  ;;  %v3308_v63 = vld [vmem:[%s5403_s6 + $0xa4] sm:$0xf]  ;;  %v2559_v47 = vpop.permute.xlu1 %2558 }
 0x2d3   :  { %v2342_v31 = vpop.f32.mrf.mxu1  ;;  %v3182_v5 = vor.u32 %v3308_v63, %v3179_v54 }
 0x2d4   :  { %v3505_v15 = vpop.eup %3504  ;;  %3508 = vtanh.f32 %v1693_v43  ;;  %v2343_v21 = vadd.f32 %v2342_v31, %v2254_v61 }
 0x2d5   :  { %v2698_v55 = vmul.f32 %v3505_v15, %v2549_v1  ;;  %2483 = vmatpush.bf16.msra.mxu2 %v5475_v46  ;;  %v5232_v22 = vpop.eup %3506 }
 0x2d6   :  { %3510 = vtanh.f32 %v2343_v21  ;;  %2295 = vmatmul.bf16.gmra.mxu3 %v3178_v28 }
 0x2d7   :  { %v2729_v33 = vadd.f32 %v2728_v10, %v2698_v55 }
 0x2d9   :  { %v1695_v52 = vpop.f32.mrf.mxu2  ;;  %v2256_v19 = vpop.f32.mrf.mxu3  ;;  %2484 = vmatpush.bf16.msra.mxu2 %v5476_v36 }
 0x2da   :  { %v5237_v12 = vpop.eup %3508  ;;  %v1696_v51 = vadd.f32 %v1695_v52, %v1607_v18  ;;  %v2257_v57 = vadd.f32 %v2256_v19, %v4988_v4  ;;  %v1609_v4 = vadd.f32 %v4743_v23, %v4869_v27  ;;  %v3310_v23 = vld [vmem:[%s5403_s6 + $0xb4] sm:$0xf]  ;;  %v3187_v27 = vld [vmem:[%s5403_s6 + $0xb8] sm:$0xf0] }
 0x2db   :  { %v2345_v11 = vpop.f32.mrf.mxu1  ;;  %v2457_v2 = vpack.c.bf16 %v5237_v12, %v5232_v22  ;;  %v3190_v21 = vor.u32 %v3310_v23, %v3187_v27  ;;  %v3201_v23 = vld [vmem:[%s5403_s6 + $0xd0] sm:$0xf]  ;;  %v3315_v27 = vld [vmem:[%s5403_s6 + $0xd4] sm:$0xf0] }
 0x2dc   :  { %v3511_v13 = vpop.eup %3510  ;;  %v2346_v25 = vadd.f32 %v2345_v11, %v2257_v57  ;;  %2485 = vmatmul.bf16.vlgmr.msra.gmra.mxu2 %v2473_v37  ;;  %v3193_v37 = vld [vmem:[%s5403_s6 + $0xc0] sm:$0xf] }
 0x2dd   :  { %v2699_v6 = vmul.f32 %v3511_v13, %v2554_v49  ;;  %v2569_v13 = vpop.permute.xlu0 %2568 }
 0x2de   :  { %3512 = vtanh.f32 %v2346_v25  ;;  %2384 = vmatmul.bf16.gmra.mxu1 %v3182_v5 }
 0x2df   :  { %v2730_v40 = vadd.f32 %v2729_v33, %v2699_v6  ;;  %3514 = vtanh.f32 %v1696_v51  ;;  %v2564_v33 = vpop.permute.xlu2 %2563 }
 0x2e1   :  { %v1697_v42 = vpop.f32.mrf.mxu2  ;;  %v2258_v34 = vpop.f32.mrf.mxu3 }
 0x2e2   :  { %v1698_v30 = vadd.f32 %v1697_v42, %v1609_v4  ;;  %v2259_v10 = vadd.f32 %v2258_v34, %v5014_v56 }
 0x2e3   :  { %v2347_v7 = vpop.f32.mrf.mxu1 }
 0x2e4   :  { %v3513_v58 = vpop.eup %3512  ;;  %3516 = vtanh.f32 %v1698_v30  ;;  %v2348_v26 = vadd.f32 %v2347_v7, %v2259_v10  ;;  %v5478_v30 = vld [vmem:[#allocation23_spill] sm:$0xff] }
 0x2e5   :  { %v2700_v0 = vmul.f32 %v3513_v58, %v2559_v47  ;;  %v5257_v56 = vpop.eup %3514 }
 0x2e6   :  { %3518 = vtanh.f32 %v2348_v26  ;;  %2300 = vmatmul.bf16.gmra.mxu3 %v3186_v60  ;;  %v2574_v26 = vpop.permute.xlu1 %2573 }
 0x2e7   :  { %v2731_v43 = vadd.f32 %v2730_v40, %v2700_v0 }
 0x2e9   :  { %v1700_v61 = vpop.f32.mrf.mxu2  ;;  %v2261_v28 = vpop.f32.mrf.mxu3 }
 0x2ea   :  { %v5259_v31 = vpop.eup %3516  ;;  %v1701_v15 = vadd.f32 %v1700_v61, %v4751_v39  ;;  %v2262_v1 = vadd.f32 %v2261_v28, %v5020_v20  ;;  %v3313_v39 = vld [vmem:[%s5403_s6 + $0xc4] sm:$0xf0]  ;;  %v1614_v20 = vadd.f32 %v4759_v50, %v4896_v17  ;;  %v3312_v50 = vld [vmem:[%s5403_s6 + $0xc4] sm:$0xf]  ;;  %v3195_v17 = vld [vmem:[%s5403_s6 + $0xc8] sm:$0xf0] }
 0x2eb   :  { %v2350_v29 = vpop.f32.mrf.mxu1  ;;  %v2458_v55 = vpack.c.bf16 %v5259_v31, %v5257_v56  ;;  %v3194_v57 = vor.u32 %v3313_v39, %v3193_v37  ;;  %v3198_v60 = vor.u32 %v3312_v50, %v3195_v17  ;;  %v3314_v37 = vld [vmem:[%s5403_s6 + $0xd4] sm:$0xf]  ;;  %v3203_v39 = vld [vmem:[%s5403_s6 + $0xd8] sm:$0xf0]  ;;  %v3317_v50 = vld [vmem:[%s5403_s6 + $0xe4] sm:$0xf0] }
 0x2ec   :  { %v3519_v46 = vpop.eup %3518  ;;  %v2351_v63 = vadd.f32 %v2350_v29, %v2262_v1  ;;  %v5504_v56 = vld [vmem:[#allocation35_spill] sm:$0xff] }
 0x2ed   :  { %v2701_v54 = vmul.f32 %v3519_v46, %v2564_v33  ;;  %v2579_v33 = vpop.permute.xlu2 %2578 }
 0x2ee   :  { %3520 = vtanh.f32 %v2351_v63  ;;  %2389 = vmatmul.bf16.gmra.mxu1 %v3190_v21  ;;  %v3202_v21 = vor.u32 %v3315_v27, %v3201_v23  ;;  %v5482_v27 = vld [vmem:[#allocation28_spill] sm:$0xff] }
 0x2ef   :  { %v2732_v18 = vadd.f32 %v2731_v43, %v2701_v54  ;;  %3522 = vtanh.f32 %v1701_v15  ;;  %v5479_v15 = vld [vmem:[#allocation25_spill] sm:$0xff] }
 0x2f1   :  { %v1702_v52 = vpop.f32.mrf.mxu2  ;;  %v2263_v19 = vpop.f32.mrf.mxu3 }
 0x2f2   :  { %v1703_v36 = vadd.f32 %v1702_v52, %v1614_v20  ;;  %v2264_v51 = vadd.f32 %v2263_v19, %v5018_v48  ;;  %v5477_v48 = vld [vmem:[#allocation10_spill] sm:$0xff]  ;;  %v5480_v19 = vld [vmem:[#allocation24_spill] sm:$0xff] }
 0x2f3   :  { %v2352_v5 = vpop.f32.mrf.mxu1  ;;  %v1617_v40 = vadd.f32 %v5477_v48, %v4894_v16 }
 0x2f4   :  { %v3521_v11 = vpop.eup %3520  ;;  %3524 = vtanh.f32 %v1703_v36  ;;  %v2353_v49 = vadd.f32 %v2352_v5, %v2264_v51  ;;  %v3206_v51 = vor.u32 %v3314_v37, %v3203_v39 }
 0x2f5   :  { %v2702_v25 = vmul.f32 %v3521_v11, %v2569_v13  ;;  %v5282_v44 = vpop.eup %3522  ;;  %v2584_v11 = vpop.permute.xlu0 %2583 }
 0x2f6   :  { %3526 = vtanh.f32 %v2353_v49  ;;  %2305 = vmatmul.bf16.gmra.mxu3 %v3194_v57 }
 0x2f7   :  { %v2733_v6 = vadd.f32 %v2732_v18, %v2702_v25 }
 0x2f9   :  { %v1705_v14 = vpop.f32.mrf.mxu2  ;;  %v2266_v4 = vpop.f32.mrf.mxu3 }
 0x2fa   :  { %v5284_v42 = vpop.eup %3524  ;;  %v5286_v34 = vadd.f32 %v1705_v14, %v1617_v40  ;;  %v2267_v10 = vadd.f32 %v2266_v4, %v5478_v30  ;;  %v5481_v40 = vld [vmem:[#allocation26_spill] sm:$0xff] }
 0x2fb   :  { %v2355_v7 = vpop.f32.mrf.mxu1  ;;  %v2459_v58 = vpack.c.bf16 %v5284_v42, %v5282_v44 }
 0x2fc   :  { %v3527_v47 = vpop.eup %3526  ;;  %v2356_v0 = vadd.f32 %v2355_v7, %v2267_v10 }
 0x2fd   :  { %v2703_v43 = vmul.f32 %v3527_v47, %v2574_v26 }
 0x2fe   :  { %3528 = vtanh.f32 %v2356_v0  ;;  %2394 = vmatmul.bf16.gmra.mxu1 %v3198_v60  ;;  %v2589_v60 = vpop.permute.xlu1 %2588  ;;  %v3316_v0 = vld [vmem:[%s5403_s6 + $0xe4] sm:$0xf] }
 0x2ff   :  { %v2734_v16 = vadd.f32 %v2733_v6, %v2703_v43  ;;  %v3209_v6 = vld [vmem:[%s5403_s6 + $0xe0] sm:$0xf]  ;;  %v3211_v43 = vld [vmem:[%s5403_s6 + $0xe8] sm:$0xf0] }
 0x300   :  { %v3210_v4 = vor.u32 %v3317_v50, %v3209_v6  ;;  %v3219_v6 = vld [vmem:[%s5403_s6 + $0xf8] sm:$0xf0] }
 0x301   :  { %v5297_v61 = vpop.f32.mrf.mxu2  ;;  %v2268_v28 = vpop.f32.mrf.mxu3 }
 0x302   :  { %v2269_v1 = vadd.f32 %v2268_v28, %v5479_v15  ;;  %v3214_v15 = vor.u32 %v3316_v0, %v3211_v43 }
 0x303   :  { %v2357_v29 = vpop.f32.mrf.mxu1 }
 0x304   :  { %v3529_v46 = vpop.eup %3528  ;;  %v2358_v63 = vadd.f32 %v2357_v29, %v2269_v1  ;;  %v2594_v29 = vpop.permute.xlu2 %2593 }
 0x305   :  { %v2704_v54 = vmul.f32 %v3529_v46, %v2579_v33 }
 0x306   :  { %3530 = vtanh.f32 %v2358_v63  ;;  %2310 = vmatmul.bf16.gmra.mxu3 %v3202_v21 }
 0x307   :  { %v2735_v18 = vadd.f32 %v2734_v16, %v2704_v54  ;;  %v3217_v54 = vld [vmem:[%s5403_s6 + $0xf0] sm:$0xf] }
 0x309   :  { %v5306_v20 = vpop.f32.mrf.mxu2  ;;  %v2271_v52 = vpop.f32.mrf.mxu3 }
 0x30a   :  { %v2272_v36 = vadd.f32 %v2271_v52, %v5480_v19  ;;  %v5483_v52 = vld [vmem:[#allocation27_spill] sm:$0xff] }
 0x30b   :  { %v2360_v57 = vpop.f32.mrf.mxu1 }
 0x30c   :  { %v3531_v5 = vpop.eup %3530  ;;  %v2361_v13 = vadd.f32 %v2360_v57, %v2272_v36 }
 0x30d   :  { %v2705_v49 = vmul.f32 %v3531_v5, %v2584_v11  ;;  %v2599_v5 = vpop.permute.xlu0 %2598 }
 0x30e   :  { %3532 = vtanh.f32 %v2361_v13  ;;  %2399 = vmatmul.bf16.gmra.mxu1 %v3206_v51 }
 0x30f   :  { %v2736_v25 = vadd.f32 %v2735_v18, %v2705_v49  ;;  %v3319_v18 = vld [vmem:[%s5403_s6 + $0xf4] sm:$0xf0] }
 0x310   :  { %v3218_v36 = vor.u32 %v3319_v18, %v3217_v54  ;;  %v5491_v18 = vld [vmem:[#allocation17_spill] sm:$0xff] }
 0x311   :  { %v5315_v17 = vpop.f32.mrf.mxu2  ;;  %v2273_v48 = vpop.f32.mrf.mxu3 }
 0x312   :  { %v2274_v14 = vadd.f32 %v2273_v48, %v5481_v40  ;;  %v5484_v40 = vld [vmem:[#allocation29_spill] sm:$0xff] }
 0x313   :  { %v2362_v30 = vpop.f32.mrf.mxu1 }
 0x314   :  { %v3533_v10 = vpop.eup %3532  ;;  %v2363_v7 = vadd.f32 %v2362_v30, %v2274_v14 }
 0x315   :  { %v2706_v47 = vmul.f32 %v3533_v10, %v2589_v60  ;;  %v2604_v60 = vpop.permute.xlu1 %2603 }
 0x316   :  { %3534 = vtanh.f32 %v2363_v7  ;;  %2315 = vmatmul.bf16.gmra.mxu3 %v3210_v4 }
 0x317   :  { %v2737_v26 = vadd.f32 %v2736_v25, %v2706_v47  ;;  %v3318_v25 = vld [vmem:[%s5403_s6 + $0xf4] sm:$0xf]  ;;  %v5485_v47 = vld [vmem:[#allocation20_spill] sm:$0xff]  ;;  %s3223_s6 = sld [smem:[#allocation2 + $0x1]] }
 0x318   :  { %v3222_v4 = vor.u32 %v3318_v25, %v3219_v6  ;;  %v5495_v25 = vld [vmem:[#allocation18_spill] sm:$0xff] }
 0x319   :  { %v1715_v16 = vpop.f32.mrf.mxu2  ;;  %v2276_v23 = vpop.f32.mrf.mxu3 }
 0x31a   :  { %v2277_v28 = vadd.f32 %v2276_v23, %v5482_v27  ;;  %v5487_v23 = vld [vmem:[#allocation21_spill] sm:$0xff]  ;;  %v5488_v27 = vld [vmem:[#allocation11_spill] sm:$0xff] }
 0x31b   :  { %v2365_v1 = vpop.f32.mrf.mxu1 }
 0x31c   :  { %v3535_v21 = vpop.eup %3534  ;;  %v2366_v46 = vadd.f32 %v2365_v1, %v2277_v28  ;;  %v1629_v28 = vadd.f32 %v5488_v27, %v5487_v23  ;;  %v5500_v23 = vld [vmem:[#allocation30_spill] sm:$0xff] }
 0x31d   :  { %v2707_v33 = vmul.f32 %v3535_v21, %v2594_v29  ;;  %v5489_v21 = vld [vmem:[#allocation22_spill] sm:$0xff] }
 0x31e   :  { %3536 = vtanh.f32 %v2366_v46  ;;  %2404 = vmatmul.bf16.gmra.mxu1 %v3214_v15  ;;  %v5490_v29 = vld [vmem:[#allocation14_spill] sm:$0xff] }
 0x31f   :  { %v2738_v63 = vadd.f32 %v2737_v26, %v2707_v33  ;;  %v5486_v26 = vld [vmem:[#allocation15_spill] sm:$0xff]  ;;  %v1634_v46 = vadd.f32 %v5490_v29, %v5489_v21  ;;  %v2614_v29 = vpop.permute.xlu0 %2613 }
 0x320   :  { %v1632_v0 = vadd.f32 %v5486_v26, %v5485_v47 }
 0x321   :  { %v1717_v37 = vpop.f32.mrf.mxu2  ;;  %v2278_v39 = vpop.f32.mrf.mxu3 }
 0x322   :  { %v2279_v19 = vadd.f32 %v2278_v39, %v5483_v52  ;;  %v1718_v33 = vadd.f32 %v1717_v37, %v1629_v28  ;;  %v5492_v39 = vld [vmem:[#allocation19_spill] sm:$0xff] }
 0x323   :  { %v2367_v51 = vpop.f32.mrf.mxu1  ;;  %v1627_v52 = vadd.f32 %v5492_v39, %v5491_v18  ;;  %v5501_v39 = vld [vmem:[#allocation32_spill] sm:$0xff] }
 0x324   :  { %v3537_v57 = vpop.eup %3536  ;;  %v2368_v11 = vadd.f32 %v2367_v51, %v2279_v19 }
 0x325   :  { %v2708_v13 = vmul.f32 %v3537_v57, %v2599_v5  ;;  %v1716_v6 = vadd.f32 %v1715_v16, %v1627_v52 }
 0x326   :  { %3538 = vtanh.f32 %v2368_v11  ;;  %2320 = vmatmul.bf16.gmra.mxu3 %v3218_v36  ;;  %v5493_v36 = vld [vmem:[#allocation31_spill] sm:$0xff]  ;;  %v2609_v11 = vpop.permute.xlu2 %2608 }
 0x327   :  { %v2739_v49 = vadd.f32 %v2738_v63, %v2708_v13  ;;  %v5494_v13 = vld [vmem:[#allocation9_spill] sm:$0xff] }
 0x329   :  { %v1720_v50 = vpop.f32.mrf.mxu2  ;;  %v2281_v48 = vpop.f32.mrf.mxu3 }
 0x32a   :  { %v2282_v14 = vadd.f32 %v2281_v48, %v5484_v40  ;;  %v1721_v1 = vadd.f32 %v1720_v50, %v1632_v0  ;;  %v5496_v48 = vld [vmem:[#allocation12_spill] sm:$0xff]  ;;  %v5497_v40 = vld [vmem:[#allocation13_spill] sm:$0xff] }
 0x32b   :  { %v2370_v30 = vpop.f32.mrf.mxu1 }
 0x32c   :  { %v3539_v10 = vpop.eup %3538  ;;  %v2371_v7 = vadd.f32 %v2370_v30, %v2282_v14  ;;  %v1622_v14 = vadd.f32 %v5497_v40, %v5496_v48  ;;  %v5498_v30 = vld [vmem:[#allocation16_spill] sm:$0xff] }
 0x32d   :  { %v2709_v43 = vmul.f32 %v3539_v10, %v2604_v60  ;;  %v5499_v10 = vld [vmem:[#allocation8_spill] sm:$0xff] }
 0x32e   :  { %3540 = vtanh.f32 %v2371_v7  ;;  %2409 = vmatmul.bf16.gmra.mxu1 %v3222_v4  ;;  %v1619_v60 = vadd.f32 %v5499_v10, %v5498_v30  ;;  %v1711_v47 = vadd.f32 %v5306_v20, %v1622_v14  ;;  %v2624_v14 = vpop.permute.xlu2 %2623 }
 0x32f   :  { %v2740_v15 = vadd.f32 %v2739_v49, %v2709_v43  ;;  %3542 = vtanh.f32 %v1721_v1  ;;  %v1624_v49 = vadd.f32 %v5495_v25, %v5494_v13 }
 0x330   :  { %v1708_v16 = vadd.f32 %v5297_v61, %v1619_v60 }
 0x331   :  { %v1722_v63 = vpop.f32.mrf.mxu2  ;;  %v2283_v54 = vpop.f32.mrf.mxu3  ;;  %v1713_v4 = vadd.f32 %v5315_v17, %v1624_v49 }
 0x332   :  { %v1723_v19 = vadd.f32 %v1722_v63, %v1634_v46  ;;  %v2284_v51 = vadd.f32 %v2283_v54, %v5493_v36 }
 0x333   :  { %v2372_v57 = vpop.f32.mrf.mxu1 }
 0x334   :  { %v3541_v5 = vpop.eup %3540  ;;  %3544 = vtanh.f32 %v1723_v19  ;;  %v2373_v50 = vadd.f32 %v2372_v57, %v2284_v51 }
 0x335   :  { %3546 = vtanh.f32 %v1718_v33  ;;  %v2710_v37 = vmul.f32 %v3541_v5, %v2609_v11  ;;  %v3543_v26 = vpop.eup %3542  ;;  %v2619_v5 = vpop.permute.xlu1 %2618 }
 0x336   :  { %3548 = vtanh.f32 %v2373_v50 }
 0x337   :  { %v2741_v7 = vadd.f32 %v2740_v15, %v2710_v37  ;;  %3550 = vtanh.f32 %v1716_v6 }
 0x338   :  { %3552 = vtanh.f32 %v1713_v4 }
 0x339   :  { %v2286_v0 = vpop.f32.mrf.mxu3  ;;  %3554 = vtanh.f32 %v1711_v47 }
 0x33a   :  { %v3545_v43 = vpop.eup %3544  ;;  %v2287_v27 = vadd.f32 %v2286_v0, %v5500_v23  ;;  %3556 = vtanh.f32 %v1708_v16  ;;  %v2629_v0 = vpop.permute.xlu0 %2628  ;;  %v2472_v23 = vunpack.c.h.b16 %v5217_v3 }
 0x33b   :  { %v3547_v28 = vpop.eup %3546  ;;  %v2375_v1 = vpop.f32.mrf.mxu1  ;;  %v2463_v21 = vpack.c.bf16 %v3545_v43, %v3543_v26 }
 0x33c   :  { %v3549_v17 = vpop.eup %3548  ;;  %v2376_v46 = vadd.f32 %v2375_v1, %v2287_v27  ;;  %v2474_v42 = vpack.c.b16 %v2472_v23, %v2472_v23 }
 0x33d   :  { %v2711_v15 = vmul.f32 %v3549_v17, %v2614_v29  ;;  %2490 = vmatpush.bf16.msra.mxu3 %v2463_v21  ;;  %v3551_v20 = vpop.eup %3550  ;;  %v2634_v1 = vpop.permute.xlu1 %2633 }
 0x33e   :  { %3558 = vtanh.f32 %v2376_v46  ;;  %v2462_v63 = vpack.c.bf16 %v3547_v28, %v3551_v20  ;;  %v3553_v61 = vpop.eup %3552  ;;  %v2639_v46 = vpop.permute.xlu2 %2638 }
 0x33f   :  { %v2742_v33 = vadd.f32 %v2741_v7, %v2711_v15  ;;  %3560 = vtanh.f32 %v5286_v34  ;;  %v3555_v18 = vpop.eup %3554  ;;  %v5502_v34 = vld [vmem:[#allocation34_spill] sm:$0xff]  ;;  %v5503_v7 = vld [vmem:[#allocation33_spill] sm:$0xff] }
 0x340   :  { %v3557_v19 = vpop.eup %3556  ;;  %v2461_v51 = vpack.c.bf16 %v3553_v61, %v3555_v18 }
 0x341   :  { %v2288_v54 = vpop.f32.mrf.mxu3  ;;  %2491 = vmatpush.bf16.msra.mxu3 %v2462_v63 }
 0x342   :  { %v2289_v52 = vadd.f32 %v2288_v54, %v5501_v39 }
 0x343   :  { %v2377_v36 = vpop.f32.mrf.mxu1 }
 0x344   :  { %v3559_v57 = vpop.eup %3558  ;;  %v2378_v11 = vadd.f32 %v2377_v36, %v2289_v52 }
 0x345   :  { %v2712_v13 = vmul.f32 %v3559_v57, %v2619_v5  ;;  %2492 = vmatpush.bf16.msra.mxu3 %v2461_v51  ;;  %v3561_v25 = vpop.eup %3560  ;;  %v5505_v5 = vld [vmem:[#allocation36_spill] sm:$0xff] }
 0x346   :  { %3562 = vtanh.f32 %v2378_v11  ;;  %v2460_v6 = vpack.c.bf16 %v3557_v19, %v3561_v25  ;;  %v2644_v25 = vpop.permute.xlu0 %2643 }
 0x347   :  { %v2743_v49 = vadd.f32 %v2742_v33, %v2712_v13 }
 0x349   :  { %v2291_v50 = vpop.f32.mrf.mxu3  ;;  %2493 = vmatpush.bf16.msra.mxu3 %v2460_v6  ;;  %v5506_v6 = vld [vmem:[#allocation37_spill] sm:$0xff] }
 0x34a   :  { %v2292_v37 = vadd.f32 %v2291_v50, %v5502_v34 }
 0x34b   :  { %v2380_v48 = vpop.f32.mrf.mxu1 }
 0x34c   :  { %v3563_v40 = vpop.eup %3562  ;;  %v2381_v4 = vadd.f32 %v2380_v48, %v2292_v37  ;;  %v5507_v48 = vld [vmem:[#allocation39_spill] sm:$0xff] }
 0x34d   :  { %v2713_v30 = vmul.f32 %v3563_v40, %v2624_v14  ;;  %2494 = vmatpush.bf16.msra.mxu3 %v2459_v58  ;;  %v2649_v14 = vpop.permute.xlu1 %2648 }
 0x34e   :  { %3564 = vtanh.f32 %v2381_v4  ;;  %v2659_v23 = vpop.permute.xlu0 %2658 }
 0x34f   :  { %v2744_v10 = vadd.f32 %v2743_v49, %v2713_v30  ;;  %v5508_v30 = vld [vmem:[#allocation38_spill] sm:$0xff] }
 0x351   :  { %v2293_v60 = vpop.f32.mrf.mxu3  ;;  %2495 = vmatpush.bf16.msra.mxu3 %v2458_v55 }
 0x352   :  { %v2294_v47 = vadd.f32 %v2293_v60, %v5503_v7 }
 0x353   :  { %v2382_v26 = vpop.f32.mrf.mxu1 }
 0x354   :  { %v3565_v16 = vpop.eup %3564  ;;  %v2383_v43 = vadd.f32 %v2382_v26, %v2294_v47  ;;  %v2654_v47 = vpop.permute.xlu2 %2653 }
 0x355   :  { %v2714_v27 = vmul.f32 %v3565_v16, %v2629_v0  ;;  %2496 = vmatpush.bf16.msra.mxu3 %v2457_v2 }
 0x356   :  { %3566 = vtanh.f32 %v2383_v43 }
 0x357   :  { %v2745_v44 = vadd.f32 %v2744_v10, %v2714_v27 }
 0x359   :  { %v2296_v58 = vpop.f32.mrf.mxu3  ;;  %2497 = vmatpush.bf16.msra.mxu3 %v2456_v24 }
 0x35a   :  { %v2297_v31 = vadd.f32 %v2296_v58, %v5504_v56 }
 0x35b   :  { %v2385_v55 = vpop.f32.mrf.mxu1 }
 0x35c   :  { %v3567_v28 = vpop.eup %3566  ;;  %v2386_v21 = vadd.f32 %v2385_v55, %v2297_v31  ;;  %2498 = vmatmul.bf16.vlgmr.msra.gmra.mxu3 %v2474_v42  ;;  %v2664_v55 = vpop.permute.xlu1 %2663 }
 0x35d   :  { %v2715_v3 = vmul.f32 %v3567_v28, %v2634_v1 }
 0x35e   :  { %3568 = vtanh.f32 %v2386_v21 }
 0x35f   :  { %v2746_v17 = vadd.f32 %v2745_v44, %v2715_v3  ;;  %v5376_v22 = vpop.f32.mrf.mxu2 }
 0x361   :  { %v2298_v12 = vpop.f32.mrf.mxu3 }
 0x362   :  { %v2299_v57 = vadd.f32 %v2298_v12, %v5121_v53 }
 0x363   :  { %v2387_v2 = vpop.f32.mrf.mxu1 }
 0x364   :  { %v3569_v29 = vpop.eup %3568  ;;  %v2388_v49 = vadd.f32 %v2387_v2, %v2299_v57 }
 0x365   :  { %v2716_v15 = vmul.f32 %v3569_v29, %v2639_v46  ;;  %v2669_v46 = vpop.permute.xlu2 %2668 }
 0x366   :  { %3570 = vtanh.f32 %v2388_v49 }
 0x367   :  { %v2747_v20 = vadd.f32 %v2746_v17, %v2716_v15  ;;  %v2488_v32 = vpop.f32.mrf.mxu2 }
 0x369   :  { %v2301_v62 = vpop.f32.mrf.mxu3 }
 0x36a   :  { %v2302_v11 = vadd.f32 %v2301_v62, %v5505_v5 }
 0x36b   :  { %v2390_v24 = vpop.f32.mrf.mxu1 }
 0x36c   :  { %v2391_v37 = vadd.f32 %v2390_v24, %v2302_v11  ;;  %v3571_v43 = vpop.eup %3570  ;;  %v2674_v24 = vpop.permute.xlu0 %2673 }
 0x36d   :  { %v2717_v31 = vmul.f32 %v3571_v43, %v2644_v25  ;;  %v2684_v49 = vpop.permute.xlu2 %2683 }
 0x36e   :  { %3572 = vtanh.f32 %v2391_v37 }
 0x36f   :  { %v2748_v12 = vadd.f32 %v2747_v20, %v2717_v31  ;;  %v2679_v20 = vpop.permute.xlu1 %2678 }
 0x371   :  { %v2303_v33 = vpop.f32.mrf.mxu3 }
 0x372   :  { %v2304_v50 = vadd.f32 %v2303_v33, %v5506_v6 }
 0x373   :  { %v2392_v63 = vpop.f32.mrf.mxu1 }
 0x374   :  { %v2393_v4 = vadd.f32 %v2392_v63, %v2304_v50  ;;  %v3573_v42 = vpop.eup %3572 }
 0x375   :  { %v2718_v1 = vmul.f32 %v3573_v42, %v2649_v14  ;;  %v2768_v42 = vld [vmem:[%s5398_s1] sm:$0xff]  ;;  %s2797_s1 = sshll.u32 %s5410_s13, 4  ;;  %s2798_s1 = int_to_ptr.hbm [resolvable:$true] %s2797_s1 }
 0x376   :  { %3574 = vtanh.f32 %v2393_v4 }
 0x377   :  { %v2694_v4 = vpop.permute.xlu1 %2693 }
 0x379   :  { %v2306_v61 = vpop.f32.mrf.mxu3 }
 0x37a   :  { %v2307_v40 = vadd.f32 %v2306_v61, %v5507_v48 }
 0x37b   :  { %v2395_v54 = vpop.f32.mrf.mxu1 }
 0x37c   :  { %v2396_v60 = vadd.f32 %v2395_v54, %v2307_v40 }
 0x37e   :  { %3576 = vtanh.f32 %v2396_v60 }
 0x381   :  { %v2308_v18 = vpop.f32.mrf.mxu3 }
 0x382   :  { %v2309_v10 = vadd.f32 %v2308_v18, %v5508_v30 }
 0x383   :  { %v2397_v39 = vpop.f32.mrf.mxu1 }
 0x384   :  { %v2398_v26 = vadd.f32 %v2397_v39, %v2309_v10 }
 0x386   :  { %3578 = vtanh.f32 %v2398_v26 }
 0x389   :  { %v2311_v52 = vpop.f32.mrf.mxu3 }
 0x38a   :  { %v2312_v53 = vadd.f32 %v2311_v52, %v5148_v38  ;;  %v3575_v38 = vpop.eup %3574 }
 0x38b   :  { %v2400_v19 = vpop.f32.mrf.mxu1  ;;  %v2719_v2 = vmul.f32 %v3575_v38, %v2654_v47 }
 0x38c   :  { %v2401_v27 = vadd.f32 %v2400_v19, %v2312_v53 }
 0x38e   :  { %3580 = vtanh.f32 %v2401_v27 }
 0x391   :  { %v2313_v36 = vpop.f32.mrf.mxu3 }
 0x392   :  { %v2314_v16 = vadd.f32 %v2313_v36, %v5162_v41  ;;  %v3577_v41 = vpop.eup %3576 }
 0x393   :  { %v2402_v51 = vpop.f32.mrf.mxu1  ;;  %v3579_v29 = vpop.eup %3578  ;;  %v2720_v32 = vmul.f32 %v3577_v41, %v2659_v23  ;;  %v2487_v23 = vadd.f32 %v5376_v22, %v5195_v35  ;;  %v2786_v22 = vstv %s2784_s23 }
 0x394   :  { %v2403_v58 = vadd.f32 %v2402_v51, %v2314_v16  ;;  %v3581_v62 = vpop.eup %3580  ;;  %v2721_v63 = vmul.f32 %v3579_v29, %v2664_v55  ;;  %v2766_v16 = vstv %s3223_s6  ;;  %v2775_v55 = vpop.permute.xlu2 %2774 }
 0x395   :  { %v2722_v18 = vmul.f32 %v3581_v62, %v2669_v46 }
 0x396   :  { %3582 = vtanh.f32 %v2403_v58 }
 0x399   :  { %v2316_v13 = vpop.f32.mrf.mxu3 }
 0x39a   :  { %v2317_v44 = vadd.f32 %v2316_v13, %v5160_v59 }
 0x39b   :  { %v2405_v34 = vpop.f32.mrf.mxu1 }
 0x39c   :  { %v2406_v28 = vadd.f32 %v2405_v34, %v2317_v44  ;;  %v3583_v61 = vpop.eup %3582  ;;  %v2689_v34 = vpop.permute.xlu0 %2688 }
 0x39d   :  { %v2723_v36 = vmul.f32 %v3583_v61, %v2674_v24 }
 0x39e   :  { %3584 = vtanh.f32 %v2406_v28 }
 0x3a1   :  { %v2318_v7 = vpop.f32.mrf.mxu3 }
 0x3a2   :  { %v2319_v56 = vadd.f32 %v2318_v7, %v5174_v8  ;;  %v2749_v8 = vadd.f32 %v2748_v12, %v2718_v1 }
 0x3a3   :  { %v2407_v0 = vpop.f32.mrf.mxu1 }
 0x3a4   :  { %v2408_v3 = vadd.f32 %v2407_v0, %v2319_v56  ;;  %v2750_v33 = vadd.f32 %v2749_v8, %v2719_v2 }
 0x3a6   :  { %3586 = vtanh.f32 %v2408_v3  ;;  %v2751_v54 = vadd.f32 %v2750_v33, %v2720_v32 }
 0x3a8   :  { %v2752_v19 = vadd.f32 %v2751_v54, %v2721_v63 }
 0x3a9   :  { %v2321_v21 = vpop.f32.mrf.mxu3 }
 0x3aa   :  { %v2322_v17 = vadd.f32 %v2321_v21, %v5180_v45  ;;  %v3585_v45 = vpop.eup %3584  ;;  %v2753_v11 = vadd.f32 %v2752_v19, %v2722_v18 }
 0x3ab   :  { %v2410_v59 = vpop.f32.mrf.mxu1  ;;  %v2724_v13 = vmul.f32 %v3585_v45, %v2679_v20 }
 0x3ac   :  { %v2411_v15 = vadd.f32 %v2410_v59, %v2322_v17  ;;  %v3587_v57 = vpop.eup %3586  ;;  %v2754_v6 = vadd.f32 %v2753_v11, %v2723_v36 }
 0x3ad   :  { %v2725_v50 = vmul.f32 %v3587_v57, %v2684_v49 }
 0x3ae   :  { %3588 = vtanh.f32 %v2411_v15  ;;  %v2755_v37 = vadd.f32 %v2754_v6, %v2724_v13 }
 0x3b0   :  { %v2756_v40 = vadd.f32 %v2755_v37, %v2725_v50 }
 0x3b1   :  { %v2323_v39 = vpop.f32.mrf.mxu3 }
 0x3b2   :  { %v2324_v52 = vadd.f32 %v2323_v39, %v5178_v9 }
 0x3b3   :  { %v2412_v51 = vpop.f32.mrf.mxu1 }
 0x3b4   :  { %v2413_v5 = vadd.f32 %v2412_v51, %v2324_v52  ;;  %v3589_v25 = vpop.eup %3588 }
 0x3b5   :  { %v2726_v48 = vmul.f32 %v3589_v25, %v2689_v34 }
 0x3b6   :  { %3590 = vtanh.f32 %v2413_v5 }
 0x3b7   :  { %v2757_v30 = vadd.f32 %v2756_v40, %v2726_v48 }
 0x3bc   :  { %v3591_v14 = vpop.eup %3590 }
 0x3bd   :  { %v2727_v9 = vmul.f32 %v3591_v14, %v2694_v4 }
 0x3bf   :  { %v2758_v10 = vadd.f32 %v2757_v30, %v2727_v9 }
 0x3c1   :  { %v2759_v60 = vrot.slane %v2758_v10, 4 }
 0x3c3   :  { %v2760_v53 = vadd.f32 %v2759_v60, %v2758_v10 }
 0x3c5   :  { %v2761_v7 = vrot.slane %v2760_v53, 2 }
 0x3c7   :  { %v2762_v47 = vadd.f32 %v2761_v7, %v2760_v53 }
 0x3c9   :  { %v2763_v26 = vrot.slane %v2762_v47, 1 }
 0x3cb   :  { %v2764_v0 = vadd.f32 %v2763_v26, %v2762_v47 }
 0x3cd   :  { %v2767_v43 = vadd.f32 %v2766_v16, %v2764_v0 }
 0x3cf   :  { %2789 = vst [vmem:[#allocation5 + $0x1] sm:$0x1] %v2767_v43 }
 0x3df   :  { %v2499_v27 = vpop.f32.mrf.mxu3 }
 0x3e0   :  { %v2500_v44 = vadd.f32 %v2499_v27, %v2487_v23 }
 0x3e2   :  { %3592 = vtanh.f32 %v2500_v44 }
 0x3e7   :  { %v2501_v58 = vpop.f32.mrf.mxu3 }
 0x3e8   :  { %v3593_v56 = vpop.eup %3592 }
 0x3e9   :  { %v2769_v31 = vsub.f32 %v2768_v42, %v3593_v56 }
 0x3eb   :  { %v2770_v38 = vmul.f32 %v2769_v31, %v2769_v31 }
 0x3ed   :  { %v2777_v28 = vmul.f32 %v2775_v55, %v2770_v38 }
 0x3ef   :  { %v2778_v1 = vrot.slane %v2777_v28, 4 }
 0x3f1   :  { %v2779_v21 = vadd.f32 %v2778_v1, %v2777_v28 }
 0x3f3   :  { %v2780_v41 = vrot.slane %v2779_v21, 2 }
 0x3f5   :  { %v2781_v3 = vadd.f32 %v2780_v41, %v2779_v21 }
 0x3f7   :  { %v2782_v17 = vrot.slane %v2781_v3, 1 }
 0x3f9   :  { %v2783_v35 = vadd.f32 %v2782_v17, %v2781_v3 }
 0x3fb   :  { %v2785_v12 = vmul.f32 0.5, %v2783_v35 }
 0x3fd   :  { %v2787_v2 = vsub.f32 %v2786_v22, %v2785_v12 }
 0x3ff   :  { %2788 = vst [vmem:[#allocation5] sm:$0x1] %v2787_v2 }
 0x400   :  { %2800 = dma.vmem_to_hbm [thread:$0]  %s2796_s7, 32, %s2798_s1, [#allocation3]  }
 0x401   :  { %3632 = dma.done.wait [#allocation3], 32  }
 0x402   :  { %3633 = vsyncadd [#allocation3], 4294967264 }
 0x403   :  { %2805 = vsyncpa [#allocation3], 1 }
 0x404   :  { %2806 = vsyncpa [#allocation4], 1 }

</bundles_post_ra>
